<compile_context>
chip_gen: v7x
topology: tpu7x:2x2x1
jax: 0.10.0
libtpu: 0.0.40
codegen_flags: <defaults>
</compile_context>

<pallas_src>
import functools

import jax
import jax.numpy as jnp
from jax.experimental import pallas as pl
from jax.experimental.pallas import tpu as pltpu

# ---------------------------------------------------------------------------
# config (matches CotLayerWithLayerNorm(dim=16, kernel_size=3))
# ---------------------------------------------------------------------------
DIM = 16
KS = 3
SHARE = 8          # share_planes
RADIX = 2
FACTOR = 2
EPS = 1e-5

# column indices of the packed per-channel parameter matrix `vecs`
(_KEY_G, _KEY_B, _E1_G, _E1_B, _E2_B, _GN_G, _GN_B,
 _V_G, _V_B, _BN_G, _BN_B, _SE1_B, _SE_G, _SE_B, _SE2_B) = range(15)
_NVEC = 16


# ---------------------------------------------------------------------------
# Fused kernel: one grid step == TB samples, layout (channels, TB*H*W)
# ---------------------------------------------------------------------------
def _cot_fused_kernel(x_ref, wkve_ref, we1k_ref, we2_ref, wse1_ref, wse2_ref,
                      vecs_ref, mask_ref, sel_ref, selt_ref, o_ref,
                      *, H, W, TB, dim, share):
    HW = H * W
    N = TB * HW
    k2 = KS * KS
    ngrp = dim // share            # filter groups == GroupNorm groups
    mk2 = ngrp * k2
    mid = dim // FACTOR
    attn = wse1_ref.shape[0]

    V = vecs_ref[...]
    masks = mask_ref[...]          # (9, N) 0/1 border masks (per-sample)
    sel = sel_ref[...]             # (N, TB)  lane -> sample one-hot
    selt = selt_ref[...]           # (TB, N)  sample -> lanes broadcast

    def vec(col, c):               # (c, 1) per-channel parameter column
        return V[:c, col:col + 1]

    def ln(y, g, b):               # LayerNorm over channels (axis 0)
        mu = jnp.mean(y, axis=0, keepdims=True)
        var = jnp.mean((y - mu) ** 2, axis=0, keepdims=True)
        return (y - mu) * jax.lax.rsqrt(var + EPS) * g + b

    x = x_ref[...]                                                 # (dim, N)

    # ---- zero-padded 3x3 spatial taps: XLU lane rotation + border mask ----
    offs = [(dh, dw) for dh in (-1, 0, 1) for dw in (-1, 0, 1)]    # kk = kh*3+kw

    def shift(z, kk):              # out[p] = z[p + dh*W + dw] (0 outside)
        dh, dw = offs[kk]
        d = dh * W + dw
        if d == 0:
            return z
        return pltpu.roll(z, shift=(-d) % N, axis=1) * masks[kk:kk + 1]

    # ---- fused (key | value | embed-x) matmul on the im2col slab ----------
    xcol = jnp.concatenate([shift(x, kk) for kk in range(k2)], axis=0)  # (9*dim, N)
    kve = jnp.dot(wkve_ref[...], xcol, preferred_element_type=jnp.float32)
    k = jnp.maximum(ln(kve[:dim], vec(_KEY_G, dim), vec(_KEY_B, dim)), 0.0)
    v = ln(kve[dim:2 * dim], vec(_V_G, dim), vec(_V_B, dim))
    e1 = kve[2 * dim:2 * dim + mid] + jnp.dot(
        we1k_ref[...], k, preferred_element_type=jnp.float32)
    e1 = jnp.maximum(ln(e1, vec(_E1_G, mid), vec(_E1_B, mid)), 0.0)

    # ---- embed second 1x1 + per-sample GroupNorm (segmented via sel) ------
    lin = jnp.dot(we2_ref[...], e1, preferred_element_type=jnp.float32)
    lin = lin + vec(_E2_B, mk2)                                    # (mk2, N)
    s1 = jnp.dot(lin, sel, preferred_element_type=jnp.float32)     # (mk2, TB)
    s2 = jnp.dot(lin * lin, sel, preferred_element_type=jnp.float32)
    gn_g, gn_b = vec(_GN_G, mk2), vec(_GN_B, mk2)
    inv_cnt = 1.0 / float(k2 * HW)
    filt = []                      # per group: normalized per-pixel filters (k2, N)
    for m in range(ngrp):
        mu = jnp.sum(s1[m * k2:(m + 1) * k2], axis=0, keepdims=True) * inv_cnt
        ex2 = jnp.sum(s2[m * k2:(m + 1) * k2], axis=0, keepdims=True) * inv_cnt
        var = jnp.maximum(ex2 - mu * mu, 0.0)
        stats = jnp.concatenate([mu, jax.lax.rsqrt(var + EPS)], axis=0)   # (2, TB)
        sb = jnp.dot(stats, selt, preferred_element_type=jnp.float32)     # (2, N)
        grp = lin[m * k2:(m + 1) * k2]
        filt.append((grp - sb[0:1]) * sb[1:2]
                    * gn_g[m * k2:(m + 1) * k2] + gn_b[m * k2:(m + 1) * k2])

    # ---- local_conv (aggregation_zeropad) + LN + SiLU ----------------------
    #   out[c, p] = sum_kk filt[c // share][kk, p] * v[c, p + off(kk)]
    accs = [jnp.zeros((share, N), jnp.float32) for _ in range(ngrp)]
    for kk in range(k2):
        vs = shift(v, kk)                                           # lazy tap
        for m in range(ngrp):
            accs[m] = accs[m] + filt[m][kk:kk + 1] * vs[m * share:(m + 1) * share]
    y = ln(jnp.concatenate(accs, axis=0), vec(_BN_G, dim), vec(_BN_B, dim))
    y = y * jax.nn.sigmoid(y)                                       # SiLU

    # ---- split attention (radix=2) over {local path y, key path k} --------
    # gap = per-sample mean_p(y + k), folded through the linear first 1x1
    t = jnp.dot(wse1_ref[...], y + k, preferred_element_type=jnp.float32)  # (attn, N)
    gap = jnp.dot(t, sel, preferred_element_type=jnp.float32) * (1.0 / float(HW))
    gap = gap + vec(_SE1_B, attn)                                   # (attn, TB)
    h1 = jnp.maximum(ln(gap, vec(_SE_G, attn), vec(_SE_B, attn)), 0.0)
    a = jnp.dot(wse2_ref[...], h1, preferred_element_type=jnp.float32)
    a = a + vec(_SE2_B, RADIX * dim)                                # (2*dim, TB)
    a0, a1 = a[:dim], a[dim:]                                       # r=0 (y) / r=1 (k)
    amax = jnp.maximum(a0, a1)
    p0 = jnp.exp(a0 - amax)
    p1 = jnp.exp(a1 - amax)
    inv = 1.0 / (p0 + p1)                                           # exact softmax denom
    wgt = jnp.concatenate([p0 * inv, p1 * inv], axis=0)             # (2*dim, TB)
    wgt_b = jnp.dot(wgt, selt, preferred_element_type=jnp.float32)  # (2*dim, N)
    o_ref[...] = y * wgt_b[:dim] + k * wgt_b[dim:]


# ---------------------------------------------------------------------------
# Forward wrapper: NCHW in -> NCHW out.  Picks TB samples per grid step so the
# lane axis is a multiple of 128 (lane-dense stores / full vregs).
# ---------------------------------------------------------------------------
def _choose_tb(B, HW):
    for d in range(1, B + 1):
        if B % d == 0 and (d * HW) % 128 == 0:
            return d
    return B           # fall back to the whole batch in one step


def cot_layer_forward(x_nchw, params):
    B, C, H, W = x_nchw.shape
    HW = H * W
    TB = _choose_tb(B, HW)
    nsteps = B // TB
    N = TB * HW
    k2 = KS * KS

    # (B, C, H, W) -> (C, B*HW): channels on sublanes, samples*pixels on lanes
    x = jnp.transpose(x_nchw.reshape(B, C, HW), (1, 0, 2)).reshape(C, B * HW)
    x = x.astype(jnp.float32)

    # constants: 3x3 border masks and the sample selector matrices (folded by XLA)
    lane = jnp.arange(N)
    hw = lane % HW
    hh, ww = hw // W, hw % W
    offs = [(dh, dw) for dh in (-1, 0, 1) for dw in (-1, 0, 1)]
    mask = jnp.stack(
        [((hh + dh >= 0) & (hh + dh < H) & (ww + dw >= 0) & (ww + dw < W)
          ).astype(jnp.float32) for dh, dw in offs], axis=0)        # (9, N)
    sel = (lane[:, None] // HW == jnp.arange(TB)[None, :]).astype(jnp.float32)  # (N, TB)
    selt = sel.T                                                    # (TB, N)

    kern = functools.partial(_cot_fused_kernel, H=H, W=W, TB=TB, dim=C, share=SHARE)
    const = lambda b: (0, 0)
    out = pl.pallas_call(
        kern,
        out_shape=jax.ShapeDtypeStruct((C, B * HW), jnp.float32),
        grid=(nsteps,),
        in_specs=[
            pl.BlockSpec((C, N), lambda b: (0, b)),
            pl.BlockSpec(params['wkve'].shape, const),
            pl.BlockSpec(params['we1k'].shape, const),
            pl.BlockSpec(params['w_e2'].shape, const),
            pl.BlockSpec(params['w_se1'].shape, const),
            pl.BlockSpec(params['w_se2'].shape, const),
            pl.BlockSpec(params['vecs'].shape, const),
            pl.BlockSpec(mask.shape, const),
            pl.BlockSpec(sel.shape, const),
            pl.BlockSpec(selt.shape, const),
        ],
        out_specs=pl.BlockSpec((C, N), lambda b: (0, b)),
        compiler_params=pltpu.CompilerParams(
            dimension_semantics=("parallel",)),   # shards steps across TCs on v7x
    )(x, params['wkve'], params['we1k'], params['w_e2'],
      params['w_se1'], params['w_se2'], params['vecs'], mask, sel, selt)
    return out.reshape(C, B, HW).transpose(1, 0, 2).reshape(B, C, H, W)


# ---------------------------------------------------------------------------
# Deterministic parameter init (shapes from CotLayerWithLayerNorm.__init__),
# pre-laid-out for the (Cout, Cin) / (channels, pixels) kernel convention.
# ---------------------------------------------------------------------------
def init_params(key, dim=DIM):
    groups = 4
    cg = dim // groups
    mid = dim // FACTOR
    k2 = KS * KS
    ngrp = dim // SHARE
    mk2 = ngrp * k2
    attn = max(dim * RADIX // 4, 32)
    keys = jax.random.split(key, 9)

    # key_embed grouped conv weight, PyTorch layout (out, in_per_group, kh, kw)
    w_key = jax.random.normal(keys[0], (dim, cg, KS, KS), jnp.float32) * 0.1
    wd = jnp.zeros((dim, dim, KS, KS), jnp.float32)      # block-diagonal dense form
    for g in range(groups):
        wd = wd.at[g * cg:(g + 1) * cg, g * cg:(g + 1) * cg].set(
            w_key[g * cg:(g + 1) * cg])
    # flatten to (co, kk*dim + ci), matching the in-kernel im2col row order
    wk_flat = jnp.transpose(wd, (0, 2, 3, 1)).reshape(dim, k2 * dim)

    w_e1 = jax.random.normal(keys[1], (mid, 2 * dim), jnp.float32) * 0.1
    w_e2 = jax.random.normal(keys[2], (mk2, mid), jnp.float32) * 0.1
    b_e2 = jax.random.normal(keys[3], (mk2,), jnp.float32) * 0.01
    w_v = jax.random.normal(keys[4], (dim, dim), jnp.float32) * 0.1
    w_se1 = jax.random.normal(keys[5], (attn, dim), jnp.float32) * 0.1
    b_se1 = jax.random.normal(keys[6], (attn,), jnp.float32) * 0.01
    w_se2 = jax.random.normal(keys[7], (RADIX * dim, attn), jnp.float32) * 0.1
    b_se2 = jax.random.normal(keys[8], (RADIX * dim,), jnp.float32) * 0.01
    # PyTorch x_attn.view(B, C, radix): se output channel c*radix + r -> (c, r).
    # Permute rows so row r*dim + c holds the (c, r) logit (radix-major halves).
    perm = jnp.array([c * RADIX + r for r in range(RADIX) for c in range(dim)])
    w_se2 = w_se2[perm]
    b_se2 = b_se2[perm]

    # fused (key | value | embed-x) weight over the im2col rows: the 1x1 convs
    # live in the center-tap (kk = 4) column block of the (.., 9*dim) matrix.
    center = (k2 // 2) * dim
    wkve = jnp.zeros((2 * dim + mid, k2 * dim), jnp.float32)
    wkve = wkve.at[:dim].set(wk_flat)
    wkve = wkve.at[dim:2 * dim, center:center + dim].set(w_v)
    wkve = wkve.at[2 * dim:, center:center + dim].set(w_e1[:, :dim])
    we1k = w_e1[:, dim:]

    # pack all per-channel affine / bias vectors into one small matrix
    nrow = max(dim, mk2, attn, RADIX * dim)
    nrow = ((nrow + 7) // 8) * 8
    vecs = jnp.zeros((nrow, _NVEC), jnp.float32)
    cols = {
        _KEY_G: jnp.ones(dim), _KEY_B: jnp.zeros(dim),
        _E1_G: jnp.ones(mid), _E1_B: jnp.zeros(mid),
        _E2_B: b_e2,
        _GN_G: jnp.ones(mk2), _GN_B: jnp.zeros(mk2),
        _V_G: jnp.ones(dim), _V_B: jnp.zeros(dim),
        _BN_G: jnp.ones(dim), _BN_B: jnp.zeros(dim),
        _SE1_B: b_se1,
        _SE_G: jnp.ones(attn), _SE_B: jnp.zeros(attn),
        _SE2_B: b_se2,
    }
    for c, val in cols.items():
        vecs = vecs.at[:val.shape[0], c].set(val)

    return dict(wkve=wkve, we1k=we1k, w_e2=w_e2,
                w_se1=w_se1, w_se2=w_se2, vecs=vecs)


# ---------------------------------------------------------------------------
if __name__ == "__main__":
    key = jax.random.PRNGKey(0)
    kx, kp = jax.random.split(key)
    B, C, H, W = 2, DIM, 8, 8
    x = jax.random.normal(kx, (B, C, H, W), jnp.float32)
    params = init_params(kp)

    fwd = jax.jit(lambda a: cot_layer_forward(a, params))
    out = jax.block_until_ready(fwd(x))
    assert out.shape == (B, C, H, W), out.shape
    assert bool(jnp.all(jnp.isfinite(out)))
    print("KERNEL_OK")
</pallas_src>

<mosaic_0001>
module attributes {stable_mosaic.version = 11 : i64} {
  func.func @_cot_fused_kernel(%arg0: i32, %arg1: memref<16x128xf32, #tpu.memory_space<vmem>>, %arg2: memref<40x144xf32, #tpu.memory_space<vmem>>, %arg3: memref<8x16xf32, #tpu.memory_space<vmem>>, %arg4: memref<18x8xf32, #tpu.memory_space<vmem>>, %arg5: memref<32x16xf32, #tpu.memory_space<vmem>>, %arg6: memref<32x32xf32, #tpu.memory_space<vmem>>, %arg7: memref<32x16xf32, #tpu.memory_space<vmem>>, %arg8: memref<9x128xf32, #tpu.memory_space<vmem>>, %arg9: memref<128x2xf32, #tpu.memory_space<vmem>>, %arg10: memref<2x128xf32, #tpu.memory_space<vmem>>, %arg11: memref<16x128xf32, #tpu.memory_space<vmem>>) attributes {dimension_semantics = [#tpu.dimension_semantics<parallel>], iteration_bounds = array<i64: 1>, scalar_prefetch = 0 : i64, scratch_operands = 0 : i64, tpu.core_type = #tpu.core_type<tc>, window_params = [{transform_indices = @transform_0, window_bounds = array<i64: 16, 128>}, {pipeline_mode = #tpu.pipeline_mode<synchronous>, transform_indices = @transform_1, window_bounds = array<i64: 40, 144>}, {pipeline_mode = #tpu.pipeline_mode<synchronous>, transform_indices = @transform_2, window_bounds = array<i64: 8, 16>}, {pipeline_mode = #tpu.pipeline_mode<synchronous>, transform_indices = @transform_3, window_bounds = array<i64: 18, 8>}, {pipeline_mode = #tpu.pipeline_mode<synchronous>, transform_indices = @transform_4, window_bounds = array<i64: 32, 16>}, {pipeline_mode = #tpu.pipeline_mode<synchronous>, transform_indices = @transform_5, window_bounds = array<i64: 32, 32>}, {pipeline_mode = #tpu.pipeline_mode<synchronous>, transform_indices = @transform_6, window_bounds = array<i64: 32, 16>}, {pipeline_mode = #tpu.pipeline_mode<synchronous>, transform_indices = @transform_7, window_bounds = array<i64: 9, 128>}, {pipeline_mode = #tpu.pipeline_mode<synchronous>, transform_indices = @transform_8, window_bounds = array<i64: 128, 2>}, {pipeline_mode = #tpu.pipeline_mode<synchronous>, transform_indices = @transform_9, window_bounds = array<i64: 2, 128>}, {transform_indices = @transform_10, window_bounds = array<i64: 16, 128>}]} {
    %c0 = arith.constant 0 : index
    %c0_0 = arith.constant 0 : index
    %0 = vector.load %arg7[%c0, %c0_0] : memref<32x16xf32, #tpu.memory_space<vmem>>, vector<32x16xf32>
    %c0_1 = arith.constant 0 : index
    %c0_2 = arith.constant 0 : index
    %1 = vector.load %arg8[%c0_1, %c0_2] : memref<9x128xf32, #tpu.memory_space<vmem>>, vector<9x128xf32>
    %c0_3 = arith.constant 0 : index
    %c0_4 = arith.constant 0 : index
    %2 = vector.load %arg9[%c0_3, %c0_4] : memref<128x2xf32, #tpu.memory_space<vmem>>, vector<128x2xf32>
    %c0_5 = arith.constant 0 : index
    %c0_6 = arith.constant 0 : index
    %3 = vector.load %arg10[%c0_5, %c0_6] : memref<2x128xf32, #tpu.memory_space<vmem>>, vector<2x128xf32>
    %c0_7 = arith.constant 0 : index
    %c0_8 = arith.constant 0 : index
    %4 = vector.load %arg1[%c0_7, %c0_8] : memref<16x128xf32, #tpu.memory_space<vmem>>, vector<16x128xf32>
    %c9_i32 = arith.constant 9 : i32
    %5 = tpu.dynamic_rotate %4 by %c9_i32 dim 1 : vector<16x128xf32>, i32 -> vector<16x128xf32>
    %6 = vector.extract_strided_slice %1 {offsets = [0, 0], sizes = [1, 128], strides = [1, 1]} : vector<9x128xf32> to vector<1x128xf32>
    %7 = vector.broadcast %6 : vector<1x128xf32> to vector<16x128xf32>
    %8 = arith.mulf %5, %7 : vector<16x128xf32>
    %c8_i32 = arith.constant 8 : i32
    %9 = tpu.dynamic_rotate %4 by %c8_i32 dim 1 : vector<16x128xf32>, i32 -> vector<16x128xf32>
    %10 = vector.extract_strided_slice %1 {offsets = [1, 0], sizes = [1, 128], strides = [1, 1]} : vector<9x128xf32> to vector<1x128xf32>
    %11 = vector.broadcast %10 : vector<1x128xf32> to vector<16x128xf32>
    %12 = arith.mulf %9, %11 : vector<16x128xf32>
    %c7_i32 = arith.constant 7 : i32
    %13 = tpu.dynamic_rotate %4 by %c7_i32 dim 1 : vector<16x128xf32>, i32 -> vector<16x128xf32>
    %14 = vector.extract_strided_slice %1 {offsets = [2, 0], sizes = [1, 128], strides = [1, 1]} : vector<9x128xf32> to vector<1x128xf32>
    %15 = vector.broadcast %14 : vector<1x128xf32> to vector<16x128xf32>
    %16 = arith.mulf %13, %15 : vector<16x128xf32>
    %c1_i32 = arith.constant 1 : i32
    %17 = tpu.dynamic_rotate %4 by %c1_i32 dim 1 : vector<16x128xf32>, i32 -> vector<16x128xf32>
    %18 = vector.extract_strided_slice %1 {offsets = [3, 0], sizes = [1, 128], strides = [1, 1]} : vector<9x128xf32> to vector<1x128xf32>
    %19 = vector.broadcast %18 : vector<1x128xf32> to vector<16x128xf32>
    %20 = arith.mulf %17, %19 : vector<16x128xf32>
    %c127_i32 = arith.constant 127 : i32
    %21 = tpu.dynamic_rotate %4 by %c127_i32 dim 1 : vector<16x128xf32>, i32 -> vector<16x128xf32>
    %22 = vector.extract_strided_slice %1 {offsets = [5, 0], sizes = [1, 128], strides = [1, 1]} : vector<9x128xf32> to vector<1x128xf32>
    %23 = vector.broadcast %22 : vector<1x128xf32> to vector<16x128xf32>
    %24 = arith.mulf %21, %23 : vector<16x128xf32>
    %c121_i32 = arith.constant 121 : i32
    %25 = tpu.dynamic_rotate %4 by %c121_i32 dim 1 : vector<16x128xf32>, i32 -> vector<16x128xf32>
    %26 = vector.extract_strided_slice %1 {offsets = [6, 0], sizes = [1, 128], strides = [1, 1]} : vector<9x128xf32> to vector<1x128xf32>
    %27 = vector.broadcast %26 : vector<1x128xf32> to vector<16x128xf32>
    %28 = arith.mulf %25, %27 : vector<16x128xf32>
    %c120_i32 = arith.constant 120 : i32
    %29 = tpu.dynamic_rotate %4 by %c120_i32 dim 1 : vector<16x128xf32>, i32 -> vector<16x128xf32>
    %30 = vector.extract_strided_slice %1 {offsets = [7, 0], sizes = [1, 128], strides = [1, 1]} : vector<9x128xf32> to vector<1x128xf32>
    %31 = vector.broadcast %30 : vector<1x128xf32> to vector<16x128xf32>
    %32 = arith.mulf %29, %31 : vector<16x128xf32>
    %c119_i32 = arith.constant 119 : i32
    %33 = tpu.dynamic_rotate %4 by %c119_i32 dim 1 : vector<16x128xf32>, i32 -> vector<16x128xf32>
    %34 = vector.extract_strided_slice %1 {offsets = [8, 0], sizes = [1, 128], strides = [1, 1]} : vector<9x128xf32> to vector<1x128xf32>
    %35 = vector.broadcast %34 : vector<1x128xf32> to vector<16x128xf32>
    %36 = arith.mulf %33, %35 : vector<16x128xf32>
    %37 = tpu.concatenate %8, %12, %16, %20, %4, %24, %28, %32, %36 in 0 : vector<16x128xf32>, vector<16x128xf32>, vector<16x128xf32>, vector<16x128xf32>, vector<16x128xf32>, vector<16x128xf32>, vector<16x128xf32>, vector<16x128xf32>, vector<16x128xf32> -> vector<144x128xf32>
    %c0_9 = arith.constant 0 : index
    %c0_10 = arith.constant 0 : index
    %38 = vector.load %arg2[%c0_9, %c0_10] : memref<40x144xf32, #tpu.memory_space<vmem>>, vector<40x144xf32>
    %cst = arith.constant dense<0.000000e+00> : vector<40x128xf32>
    %39 = tpu.matmul %38, %37, %cst {dimension_numbers = #tpu.dot_dimension_numbers<[1], [0], [0], [1], [0, 0, 1, 1], [], []>} : vector<40x144xf32>, vector<144x128xf32>, vector<40x128xf32> -> vector<40x128xf32>
    %40 = vector.extract_strided_slice %39 {offsets = [0, 0], sizes = [16, 128], strides = [1, 1]} : vector<40x128xf32> to vector<16x128xf32>
    %41 = vector.extract_strided_slice %0 {offsets = [0, 0], sizes = [16, 1], strides = [1, 1]} : vector<32x16xf32> to vector<16x1xf32>
    %42 = vector.extract_strided_slice %0 {offsets = [0, 1], sizes = [16, 1], strides = [1, 1]} : vector<32x16xf32> to vector<16x1xf32>
    %cst_11 = arith.constant dense<0.000000e+00> : vector<128xf32>
    %43 = vector.multi_reduction <add>, %40, %cst_11 [0] : vector<16x128xf32> to vector<128xf32>
    %44 = vector.shape_cast %43 : vector<128xf32> to vector<1x128xf32>
    %cst_12 = arith.constant 1.600000e+01 : f32
    %45 = vector.broadcast %cst_12 : f32 to vector<1x128xf32>
    %46 = arith.divf %44, %45 : vector<1x128xf32>
    %47 = vector.broadcast %46 : vector<1x128xf32> to vector<16x128xf32>
    %48 = arith.subf %40, %47 : vector<16x128xf32>
    %49 = arith.mulf %48, %48 : vector<16x128xf32>
    %cst_13 = arith.constant dense<0.000000e+00> : vector<128xf32>
    %50 = vector.multi_reduction <add>, %49, %cst_13 [0] : vector<16x128xf32> to vector<128xf32>
    %51 = vector.shape_cast %50 : vector<128xf32> to vector<1x128xf32>
    %cst_14 = arith.constant 1.600000e+01 : f32
    %52 = vector.broadcast %cst_14 : f32 to vector<1x128xf32>
    %53 = arith.divf %51, %52 : vector<1x128xf32>
    %54 = vector.broadcast %46 : vector<1x128xf32> to vector<16x128xf32>
    %55 = arith.subf %40, %54 : vector<16x128xf32>
    %cst_15 = arith.constant 9.99999974E-6 : f32
    %56 = vector.broadcast %cst_15 : f32 to vector<1x128xf32>
    %57 = arith.addf %53, %56 : vector<1x128xf32>
    %58 = math.rsqrt %57 : vector<1x128xf32>
    %59 = vector.broadcast %58 : vector<1x128xf32> to vector<16x128xf32>
    %60 = arith.mulf %55, %59 : vector<16x128xf32>
    %61 = vector.broadcast %41 : vector<16x1xf32> to vector<16x128xf32>
    %62 = arith.mulf %60, %61 : vector<16x128xf32>
    %63 = vector.broadcast %42 : vector<16x1xf32> to vector<16x128xf32>
    %64 = arith.addf %62, %63 : vector<16x128xf32>
    %cst_16 = arith.constant 0.000000e+00 : f32
    %65 = vector.broadcast %cst_16 : f32 to vector<16x128xf32>
    %66 = arith.maximumf %64, %65 : vector<16x128xf32>
    %67 = vector.extract_strided_slice %39 {offsets = [16, 0], sizes = [16, 128], strides = [1, 1]} : vector<40x128xf32> to vector<16x128xf32>
    %68 = vector.extract_strided_slice %0 {offsets = [0, 7], sizes = [16, 1], strides = [1, 1]} : vector<32x16xf32> to vector<16x1xf32>
    %69 = vector.extract_strided_slice %0 {offsets = [0, 8], sizes = [16, 1], strides = [1, 1]} : vector<32x16xf32> to vector<16x1xf32>
    %cst_17 = arith.constant dense<0.000000e+00> : vector<128xf32>
    %70 = vector.multi_reduction <add>, %67, %cst_17 [0] : vector<16x128xf32> to vector<128xf32>
    %71 = vector.shape_cast %70 : vector<128xf32> to vector<1x128xf32>
    %cst_18 = arith.constant 1.600000e+01 : f32
    %72 = vector.broadcast %cst_18 : f32 to vector<1x128xf32>
    %73 = arith.divf %71, %72 : vector<1x128xf32>
    %74 = vector.broadcast %73 : vector<1x128xf32> to vector<16x128xf32>
    %75 = arith.subf %67, %74 : vector<16x128xf32>
    %76 = arith.mulf %75, %75 : vector<16x128xf32>
    %cst_19 = arith.constant dense<0.000000e+00> : vector<128xf32>
    %77 = vector.multi_reduction <add>, %76, %cst_19 [0] : vector<16x128xf32> to vector<128xf32>
    %78 = vector.shape_cast %77 : vector<128xf32> to vector<1x128xf32>
    %cst_20 = arith.constant 1.600000e+01 : f32
    %79 = vector.broadcast %cst_20 : f32 to vector<1x128xf32>
    %80 = arith.divf %78, %79 : vector<1x128xf32>
    %81 = vector.broadcast %73 : vector<1x128xf32> to vector<16x128xf32>
    %82 = arith.subf %67, %81 : vector<16x128xf32>
    %cst_21 = arith.constant 9.99999974E-6 : f32
    %83 = vector.broadcast %cst_21 : f32 to vector<1x128xf32>
    %84 = arith.addf %80, %83 : vector<1x128xf32>
    %85 = math.rsqrt %84 : vector<1x128xf32>
    %86 = vector.broadcast %85 : vector<1x128xf32> to vector<16x128xf32>
    %87 = arith.mulf %82, %86 : vector<16x128xf32>
    %88 = vector.broadcast %68 : vector<16x1xf32> to vector<16x128xf32>
    %89 = arith.mulf %87, %88 : vector<16x128xf32>
    %90 = vector.broadcast %69 : vector<16x1xf32> to vector<16x128xf32>
    %91 = arith.addf %89, %90 : vector<16x128xf32>
    %92 = vector.extract_strided_slice %39 {offsets = [32, 0], sizes = [8, 128], strides = [1, 1]} : vector<40x128xf32> to vector<8x128xf32>
    %c0_22 = arith.constant 0 : index
    %c0_23 = arith.constant 0 : index
    %93 = vector.load %arg3[%c0_22, %c0_23] : memref<8x16xf32, #tpu.memory_space<vmem>>, vector<8x16xf32>
    %cst_24 = arith.constant dense<0.000000e+00> : vector<8x128xf32>
    %94 = tpu.matmul %93, %66, %cst_24 {dimension_numbers = #tpu.dot_dimension_numbers<[1], [0], [0], [1], [0, 0, 1, 1], [], []>} : vector<8x16xf32>, vector<16x128xf32>, vector<8x128xf32> -> vector<8x128xf32>
    %95 = arith.addf %92, %94 : vector<8x128xf32>
    %96 = vector.extract_strided_slice %0 {offsets = [0, 2], sizes = [8, 1], strides = [1, 1]} : vector<32x16xf32> to vector<8x1xf32>
    %97 = vector.extract_strided_slice %0 {offsets = [0, 3], sizes = [8, 1], strides = [1, 1]} : vector<32x16xf32> to vector<8x1xf32>
    %cst_25 = arith.constant dense<0.000000e+00> : vector<128xf32>
    %98 = vector.multi_reduction <add>, %95, %cst_25 [0] : vector<8x128xf32> to vector<128xf32>
    %99 = vector.shape_cast %98 : vector<128xf32> to vector<1x128xf32>
    %cst_26 = arith.constant 8.000000e+00 : f32
    %100 = vector.broadcast %cst_26 : f32 to vector<1x128xf32>
    %101 = arith.divf %99, %100 : vector<1x128xf32>
    %102 = vector.broadcast %101 : vector<1x128xf32> to vector<8x128xf32>
    %103 = arith.subf %95, %102 : vector<8x128xf32>
    %104 = arith.mulf %103, %103 : vector<8x128xf32>
    %cst_27 = arith.constant dense<0.000000e+00> : vector<128xf32>
    %105 = vector.multi_reduction <add>, %104, %cst_27 [0] : vector<8x128xf32> to vector<128xf32>
    %106 = vector.shape_cast %105 : vector<128xf32> to vector<1x128xf32>
    %cst_28 = arith.constant 8.000000e+00 : f32
    %107 = vector.broadcast %cst_28 : f32 to vector<1x128xf32>
    %108 = arith.divf %106, %107 : vector<1x128xf32>
    %109 = vector.broadcast %101 : vector<1x128xf32> to vector<8x128xf32>
    %110 = arith.subf %95, %109 : vector<8x128xf32>
    %cst_29 = arith.constant 9.99999974E-6 : f32
    %111 = vector.broadcast %cst_29 : f32 to vector<1x128xf32>
    %112 = arith.addf %108, %111 : vector<1x128xf32>
    %113 = math.rsqrt %112 : vector<1x128xf32>
    %114 = vector.broadcast %113 : vector<1x128xf32> to vector<8x128xf32>
    %115 = arith.mulf %110, %114 : vector<8x128xf32>
    %116 = vector.broadcast %96 : vector<8x1xf32> to vector<8x128xf32>
    %117 = arith.mulf %115, %116 : vector<8x128xf32>
    %118 = vector.broadcast %97 : vector<8x1xf32> to vector<8x128xf32>
    %119 = arith.addf %117, %118 : vector<8x128xf32>
    %cst_30 = arith.constant 0.000000e+00 : f32
    %120 = vector.broadcast %cst_30 : f32 to vector<8x128xf32>
    %121 = arith.maximumf %119, %120 : vector<8x128xf32>
    %c0_31 = arith.constant 0 : index
    %c0_32 = arith.constant 0 : index
    %122 = vector.load %arg4[%c0_31, %c0_32] : memref<18x8xf32, #tpu.memory_space<vmem>>, vector<18x8xf32>
    %cst_33 = arith.constant dense<0.000000e+00> : vector<18x128xf32>
    %123 = tpu.matmul %122, %121, %cst_33 {dimension_numbers = #tpu.dot_dimension_numbers<[1], [0], [0], [1], [0, 0, 1, 1], [], []>} : vector<18x8xf32>, vector<8x128xf32>, vector<18x128xf32> -> vector<18x128xf32>
    %124 = vector.extract_strided_slice %0 {offsets = [0, 4], sizes = [18, 1], strides = [1, 1]} : vector<32x16xf32> to vector<18x1xf32>
    %125 = vector.broadcast %124 : vector<18x1xf32> to vector<18x128xf32>
    %126 = arith.addf %123, %125 : vector<18x128xf32>
    %cst_34 = arith.constant dense<0.000000e+00> : vector<18x2xf32>
    %127 = tpu.matmul %126, %2, %cst_34 {dimension_numbers = #tpu.dot_dimension_numbers<[1], [0], [0], [1], [0, 0, 1, 1], [], []>} : vector<18x128xf32>, vector<128x2xf32>, vector<18x2xf32> -> vector<18x2xf32>
    %128 = arith.mulf %126, %126 : vector<18x128xf32>
    %cst_35 = arith.constant dense<0.000000e+00> : vector<18x2xf32>
    %129 = tpu.matmul %128, %2, %cst_35 {dimension_numbers = #tpu.dot_dimension_numbers<[1], [0], [0], [1], [0, 0, 1, 1], [], []>} : vector<18x128xf32>, vector<128x2xf32>, vector<18x2xf32> -> vector<18x2xf32>
    %130 = vector.extract_strided_slice %0 {offsets = [0, 5], sizes = [18, 1], strides = [1, 1]} : vector<32x16xf32> to vector<18x1xf32>
    %131 = vector.extract_strided_slice %0 {offsets = [0, 6], sizes = [18, 1], strides = [1, 1]} : vector<32x16xf32> to vector<18x1xf32>
    %132 = vector.extract_strided_slice %127 {offsets = [0, 0], sizes = [9, 2], strides = [1, 1]} : vector<18x2xf32> to vector<9x2xf32>
    %cst_36 = arith.constant dense<0.000000e+00> : vector<2xf32>
    %133 = vector.multi_reduction <add>, %132, %cst_36 [0] : vector<9x2xf32> to vector<2xf32>
    %134 = vector.shape_cast %133 : vector<2xf32> to vector<1x2xf32>
    %cst_37 = arith.constant 0.00173611112 : f32
    %135 = vector.broadcast %cst_37 : f32 to vector<1x2xf32>
    %136 = arith.mulf %134, %135 : vector<1x2xf32>
    %137 = vector.extract_strided_slice %129 {offsets = [0, 0], sizes = [9, 2], strides = [1, 1]} : vector<18x2xf32> to vector<9x2xf32>
    %cst_38 = arith.constant dense<0.000000e+00> : vector<2xf32>
    %138 = vector.multi_reduction <add>, %137, %cst_38 [0] : vector<9x2xf32> to vector<2xf32>
    %139 = vector.shape_cast %138 : vector<2xf32> to vector<1x2xf32>
    %cst_39 = arith.constant 0.00173611112 : f32
    %140 = vector.broadcast %cst_39 : f32 to vector<1x2xf32>
    %141 = arith.mulf %139, %140 : vector<1x2xf32>
    %142 = arith.mulf %136, %136 : vector<1x2xf32>
    %143 = arith.subf %141, %142 : vector<1x2xf32>
    %cst_40 = arith.constant 0.000000e+00 : f32
    %144 = vector.broadcast %cst_40 : f32 to vector<1x2xf32>
    %145 = arith.maximumf %143, %144 : vector<1x2xf32>
    %cst_41 = arith.constant 9.99999974E-6 : f32
    %146 = vector.broadcast %cst_41 : f32 to vector<1x2xf32>
    %147 = arith.addf %145, %146 : vector<1x2xf32>
    %148 = math.rsqrt %147 : vector<1x2xf32>
    %149 = tpu.concatenate %136, %148 in 0 : vector<1x2xf32>, vector<1x2xf32> -> vector<2x2xf32>
    %cst_42 = arith.constant dense<0.000000e+00> : vector<2x128xf32>
    %150 = tpu.matmul %149, %3, %cst_42 {dimension_numbers = #tpu.dot_dimension_numbers<[1], [0], [0], [1], [0, 0, 1, 1], [], []>} : vector<2x2xf32>, vector<2x128xf32>, vector<2x128xf32> -> vector<2x128xf32>
    %151 = vector.extract_strided_slice %126 {offsets = [0, 0], sizes = [9, 128], strides = [1, 1]} : vector<18x128xf32> to vector<9x128xf32>
    %152 = vector.extract_strided_slice %150 {offsets = [0, 0], sizes = [1, 128], strides = [1, 1]} : vector<2x128xf32> to vector<1x128xf32>
    %153 = vector.broadcast %152 : vector<1x128xf32> to vector<9x128xf32>
    %154 = arith.subf %151, %153 : vector<9x128xf32>
    %155 = vector.extract_strided_slice %150 {offsets = [1, 0], sizes = [1, 128], strides = [1, 1]} : vector<2x128xf32> to vector<1x128xf32>
    %156 = vector.broadcast %155 : vector<1x128xf32> to vector<9x128xf32>
    %157 = arith.mulf %154, %156 : vector<9x128xf32>
    %158 = vector.extract_strided_slice %130 {offsets = [0, 0], sizes = [9, 1], strides = [1, 1]} : vector<18x1xf32> to vector<9x1xf32>
    %159 = vector.broadcast %158 : vector<9x1xf32> to vector<9x128xf32>
    %160 = arith.mulf %157, %159 : vector<9x128xf32>
    %161 = vector.extract_strided_slice %131 {offsets = [0, 0], sizes = [9, 1], strides = [1, 1]} : vector<18x1xf32> to vector<9x1xf32>
    %162 = vector.broadcast %161 : vector<9x1xf32> to vector<9x128xf32>
    %163 = arith.addf %160, %162 : vector<9x128xf32>
    %164 = vector.extract_strided_slice %127 {offsets = [9, 0], sizes = [9, 2], strides = [1, 1]} : vector<18x2xf32> to vector<9x2xf32>
    %cst_43 = arith.constant dense<0.000000e+00> : vector<2xf32>
    %165 = vector.multi_reduction <add>, %164, %cst_43 [0] : vector<9x2xf32> to vector<2xf32>
    %166 = vector.shape_cast %165 : vector<2xf32> to vector<1x2xf32>
    %cst_44 = arith.constant 0.00173611112 : f32
    %167 = vector.broadcast %cst_44 : f32 to vector<1x2xf32>
    %168 = arith.mulf %166, %167 : vector<1x2xf32>
    %169 = vector.extract_strided_slice %129 {offsets = [9, 0], sizes = [9, 2], strides = [1, 1]} : vector<18x2xf32> to vector<9x2xf32>
    %cst_45 = arith.constant dense<0.000000e+00> : vector<2xf32>
    %170 = vector.multi_reduction <add>, %169, %cst_45 [0] : vector<9x2xf32> to vector<2xf32>
    %171 = vector.shape_cast %170 : vector<2xf32> to vector<1x2xf32>
    %cst_46 = arith.constant 0.00173611112 : f32
    %172 = vector.broadcast %cst_46 : f32 to vector<1x2xf32>
    %173 = arith.mulf %171, %172 : vector<1x2xf32>
    %174 = arith.mulf %168, %168 : vector<1x2xf32>
    %175 = arith.subf %173, %174 : vector<1x2xf32>
    %cst_47 = arith.constant 0.000000e+00 : f32
    %176 = vector.broadcast %cst_47 : f32 to vector<1x2xf32>
    %177 = arith.maximumf %175, %176 : vector<1x2xf32>
    %cst_48 = arith.constant 9.99999974E-6 : f32
    %178 = vector.broadcast %cst_48 : f32 to vector<1x2xf32>
    %179 = arith.addf %177, %178 : vector<1x2xf32>
    %180 = math.rsqrt %179 : vector<1x2xf32>
    %181 = tpu.concatenate %168, %180 in 0 : vector<1x2xf32>, vector<1x2xf32> -> vector<2x2xf32>
    %cst_49 = arith.constant dense<0.000000e+00> : vector<2x128xf32>
    %182 = tpu.matmul %181, %3, %cst_49 {dimension_numbers = #tpu.dot_dimension_numbers<[1], [0], [0], [1], [0, 0, 1, 1], [], []>} : vector<2x2xf32>, vector<2x128xf32>, vector<2x128xf32> -> vector<2x128xf32>
    %183 = vector.extract_strided_slice %126 {offsets = [9, 0], sizes = [9, 128], strides = [1, 1]} : vector<18x128xf32> to vector<9x128xf32>
    %184 = vector.extract_strided_slice %182 {offsets = [0, 0], sizes = [1, 128], strides = [1, 1]} : vector<2x128xf32> to vector<1x128xf32>
    %185 = vector.broadcast %184 : vector<1x128xf32> to vector<9x128xf32>
    %186 = arith.subf %183, %185 : vector<9x128xf32>
    %187 = vector.extract_strided_slice %182 {offsets = [1, 0], sizes = [1, 128], strides = [1, 1]} : vector<2x128xf32> to vector<1x128xf32>
    %188 = vector.broadcast %187 : vector<1x128xf32> to vector<9x128xf32>
    %189 = arith.mulf %186, %188 : vector<9x128xf32>
    %190 = vector.extract_strided_slice %130 {offsets = [9, 0], sizes = [9, 1], strides = [1, 1]} : vector<18x1xf32> to vector<9x1xf32>
    %191 = vector.broadcast %190 : vector<9x1xf32> to vector<9x128xf32>
    %192 = arith.mulf %189, %191 : vector<9x128xf32>
    %193 = vector.extract_strided_slice %131 {offsets = [9, 0], sizes = [9, 1], strides = [1, 1]} : vector<18x1xf32> to vector<9x1xf32>
    %194 = vector.broadcast %193 : vector<9x1xf32> to vector<9x128xf32>
    %195 = arith.addf %192, %194 : vector<9x128xf32>
    %cst_50 = arith.constant 0.000000e+00 : f32
    %196 = vector.broadcast %cst_50 : f32 to vector<8x128xf32>
    %cst_51 = arith.constant 0.000000e+00 : f32
    %197 = vector.broadcast %cst_51 : f32 to vector<8x128xf32>
    %c9_i32_52 = arith.constant 9 : i32
    %198 = tpu.dynamic_rotate %91 by %c9_i32_52 dim 1 : vector<16x128xf32>, i32 -> vector<16x128xf32>
    %199 = vector.extract_strided_slice %1 {offsets = [0, 0], sizes = [1, 128], strides = [1, 1]} : vector<9x128xf32> to vector<1x128xf32>
    %200 = vector.broadcast %199 : vector<1x128xf32> to vector<16x128xf32>
    %201 = arith.mulf %198, %200 : vector<16x128xf32>
    %202 = vector.extract_strided_slice %163 {offsets = [0, 0], sizes = [1, 128], strides = [1, 1]} : vector<9x128xf32> to vector<1x128xf32>
    %203 = vector.extract_strided_slice %201 {offsets = [0, 0], sizes = [8, 128], strides = [1, 1]} : vector<16x128xf32> to vector<8x128xf32>
    %204 = vector.broadcast %202 : vector<1x128xf32> to vector<8x128xf32>
    %205 = arith.mulf %204, %203 : vector<8x128xf32>
    %206 = arith.addf %196, %205 : vector<8x128xf32>
    %207 = vector.extract_strided_slice %195 {offsets = [0, 0], sizes = [1, 128], strides = [1, 1]} : vector<9x128xf32> to vector<1x128xf32>
    %208 = vector.extract_strided_slice %201 {offsets = [8, 0], sizes = [8, 128], strides = [1, 1]} : vector<16x128xf32> to vector<8x128xf32>
    %209 = vector.broadcast %207 : vector<1x128xf32> to vector<8x128xf32>
    %210 = arith.mulf %209, %208 : vector<8x128xf32>
    %211 = arith.addf %197, %210 : vector<8x128xf32>
    %c8_i32_53 = arith.constant 8 : i32
    %212 = tpu.dynamic_rotate %91 by %c8_i32_53 dim 1 : vector<16x128xf32>, i32 -> vector<16x128xf32>
    %213 = vector.extract_strided_slice %1 {offsets = [1, 0], sizes = [1, 128], strides = [1, 1]} : vector<9x128xf32> to vector<1x128xf32>
    %214 = vector.broadcast %213 : vector<1x128xf32> to vector<16x128xf32>
    %215 = arith.mulf %212, %214 : vector<16x128xf32>
    %216 = vector.extract_strided_slice %163 {offsets = [1, 0], sizes = [1, 128], strides = [1, 1]} : vector<9x128xf32> to vector<1x128xf32>
    %217 = vector.extract_strided_slice %215 {offsets = [0, 0], sizes = [8, 128], strides = [1, 1]} : vector<16x128xf32> to vector<8x128xf32>
    %218 = vector.broadcast %216 : vector<1x128xf32> to vector<8x128xf32>
    %219 = arith.mulf %218, %217 : vector<8x128xf32>
    %220 = arith.addf %206, %219 : vector<8x128xf32>
    %221 = vector.extract_strided_slice %195 {offsets = [1, 0], sizes = [1, 128], strides = [1, 1]} : vector<9x128xf32> to vector<1x128xf32>
    %222 = vector.extract_strided_slice %215 {offsets = [8, 0], sizes = [8, 128], strides = [1, 1]} : vector<16x128xf32> to vector<8x128xf32>
    %223 = vector.broadcast %221 : vector<1x128xf32> to vector<8x128xf32>
    %224 = arith.mulf %223, %222 : vector<8x128xf32>
    %225 = arith.addf %211, %224 : vector<8x128xf32>
    %c7_i32_54 = arith.constant 7 : i32
    %226 = tpu.dynamic_rotate %91 by %c7_i32_54 dim 1 : vector<16x128xf32>, i32 -> vector<16x128xf32>
    %227 = vector.extract_strided_slice %1 {offsets = [2, 0], sizes = [1, 128], strides = [1, 1]} : vector<9x128xf32> to vector<1x128xf32>
    %228 = vector.broadcast %227 : vector<1x128xf32> to vector<16x128xf32>
    %229 = arith.mulf %226, %228 : vector<16x128xf32>
    %230 = vector.extract_strided_slice %163 {offsets = [2, 0], sizes = [1, 128], strides = [1, 1]} : vector<9x128xf32> to vector<1x128xf32>
    %231 = vector.extract_strided_slice %229 {offsets = [0, 0], sizes = [8, 128], strides = [1, 1]} : vector<16x128xf32> to vector<8x128xf32>
    %232 = vector.broadcast %230 : vector<1x128xf32> to vector<8x128xf32>
    %233 = arith.mulf %232, %231 : vector<8x128xf32>
    %234 = arith.addf %220, %233 : vector<8x128xf32>
    %235 = vector.extract_strided_slice %195 {offsets = [2, 0], sizes = [1, 128], strides = [1, 1]} : vector<9x128xf32> to vector<1x128xf32>
    %236 = vector.extract_strided_slice %229 {offsets = [8, 0], sizes = [8, 128], strides = [1, 1]} : vector<16x128xf32> to vector<8x128xf32>
    %237 = vector.broadcast %235 : vector<1x128xf32> to vector<8x128xf32>
    %238 = arith.mulf %237, %236 : vector<8x128xf32>
    %239 = arith.addf %225, %238 : vector<8x128xf32>
    %c1_i32_55 = arith.constant 1 : i32
    %240 = tpu.dynamic_rotate %91 by %c1_i32_55 dim 1 : vector<16x128xf32>, i32 -> vector<16x128xf32>
    %241 = vector.extract_strided_slice %1 {offsets = [3, 0], sizes = [1, 128], strides = [1, 1]} : vector<9x128xf32> to vector<1x128xf32>
    %242 = vector.broadcast %241 : vector<1x128xf32> to vector<16x128xf32>
    %243 = arith.mulf %240, %242 : vector<16x128xf32>
    %244 = vector.extract_strided_slice %163 {offsets = [3, 0], sizes = [1, 128], strides = [1, 1]} : vector<9x128xf32> to vector<1x128xf32>
    %245 = vector.extract_strided_slice %243 {offsets = [0, 0], sizes = [8, 128], strides = [1, 1]} : vector<16x128xf32> to vector<8x128xf32>
    %246 = vector.broadcast %244 : vector<1x128xf32> to vector<8x128xf32>
    %247 = arith.mulf %246, %245 : vector<8x128xf32>
    %248 = arith.addf %234, %247 : vector<8x128xf32>
    %249 = vector.extract_strided_slice %195 {offsets = [3, 0], sizes = [1, 128], strides = [1, 1]} : vector<9x128xf32> to vector<1x128xf32>
    %250 = vector.extract_strided_slice %243 {offsets = [8, 0], sizes = [8, 128], strides = [1, 1]} : vector<16x128xf32> to vector<8x128xf32>
    %251 = vector.broadcast %249 : vector<1x128xf32> to vector<8x128xf32>
    %252 = arith.mulf %251, %250 : vector<8x128xf32>
    %253 = arith.addf %239, %252 : vector<8x128xf32>
    %254 = vector.extract_strided_slice %163 {offsets = [4, 0], sizes = [1, 128], strides = [1, 1]} : vector<9x128xf32> to vector<1x128xf32>
    %255 = vector.extract_strided_slice %91 {offsets = [0, 0], sizes = [8, 128], strides = [1, 1]} : vector<16x128xf32> to vector<8x128xf32>
    %256 = vector.broadcast %254 : vector<1x128xf32> to vector<8x128xf32>
    %257 = arith.mulf %256, %255 : vector<8x128xf32>
    %258 = arith.addf %248, %257 : vector<8x128xf32>
    %259 = vector.extract_strided_slice %195 {offsets = [4, 0], sizes = [1, 128], strides = [1, 1]} : vector<9x128xf32> to vector<1x128xf32>
    %260 = vector.extract_strided_slice %91 {offsets = [8, 0], sizes = [8, 128], strides = [1, 1]} : vector<16x128xf32> to vector<8x128xf32>
    %261 = vector.broadcast %259 : vector<1x128xf32> to vector<8x128xf32>
    %262 = arith.mulf %261, %260 : vector<8x128xf32>
    %263 = arith.addf %253, %262 : vector<8x128xf32>
    %c127_i32_56 = arith.constant 127 : i32
    %264 = tpu.dynamic_rotate %91 by %c127_i32_56 dim 1 : vector<16x128xf32>, i32 -> vector<16x128xf32>
    %265 = vector.extract_strided_slice %1 {offsets = [5, 0], sizes = [1, 128], strides = [1, 1]} : vector<9x128xf32> to vector<1x128xf32>
    %266 = vector.broadcast %265 : vector<1x128xf32> to vector<16x128xf32>
    %267 = arith.mulf %264, %266 : vector<16x128xf32>
    %268 = vector.extract_strided_slice %163 {offsets = [5, 0], sizes = [1, 128], strides = [1, 1]} : vector<9x128xf32> to vector<1x128xf32>
    %269 = vector.extract_strided_slice %267 {offsets = [0, 0], sizes = [8, 128], strides = [1, 1]} : vector<16x128xf32> to vector<8x128xf32>
    %270 = vector.broadcast %268 : vector<1x128xf32> to vector<8x128xf32>
    %271 = arith.mulf %270, %269 : vector<8x128xf32>
    %272 = arith.addf %258, %271 : vector<8x128xf32>
    %273 = vector.extract_strided_slice %195 {offsets = [5, 0], sizes = [1, 128], strides = [1, 1]} : vector<9x128xf32> to vector<1x128xf32>
    %274 = vector.extract_strided_slice %267 {offsets = [8, 0], sizes = [8, 128], strides = [1, 1]} : vector<16x128xf32> to vector<8x128xf32>
    %275 = vector.broadcast %273 : vector<1x128xf32> to vector<8x128xf32>
    %276 = arith.mulf %275, %274 : vector<8x128xf32>
    %277 = arith.addf %263, %276 : vector<8x128xf32>
    %c121_i32_57 = arith.constant 121 : i32
    %278 = tpu.dynamic_rotate %91 by %c121_i32_57 dim 1 : vector<16x128xf32>, i32 -> vector<16x128xf32>
    %279 = vector.extract_strided_slice %1 {offsets = [6, 0], sizes = [1, 128], strides = [1, 1]} : vector<9x128xf32> to vector<1x128xf32>
    %280 = vector.broadcast %279 : vector<1x128xf32> to vector<16x128xf32>
    %281 = arith.mulf %278, %280 : vector<16x128xf32>
    %282 = vector.extract_strided_slice %163 {offsets = [6, 0], sizes = [1, 128], strides = [1, 1]} : vector<9x128xf32> to vector<1x128xf32>
    %283 = vector.extract_strided_slice %281 {offsets = [0, 0], sizes = [8, 128], strides = [1, 1]} : vector<16x128xf32> to vector<8x128xf32>
    %284 = vector.broadcast %282 : vector<1x128xf32> to vector<8x128xf32>
    %285 = arith.mulf %284, %283 : vector<8x128xf32>
    %286 = arith.addf %272, %285 : vector<8x128xf32>
    %287 = vector.extract_strided_slice %195 {offsets = [6, 0], sizes = [1, 128], strides = [1, 1]} : vector<9x128xf32> to vector<1x128xf32>
    %288 = vector.extract_strided_slice %281 {offsets = [8, 0], sizes = [8, 128], strides = [1, 1]} : vector<16x128xf32> to vector<8x128xf32>
    %289 = vector.broadcast %287 : vector<1x128xf32> to vector<8x128xf32>
    %290 = arith.mulf %289, %288 : vector<8x128xf32>
    %291 = arith.addf %277, %290 : vector<8x128xf32>
    %c120_i32_58 = arith.constant 120 : i32
    %292 = tpu.dynamic_rotate %91 by %c120_i32_58 dim 1 : vector<16x128xf32>, i32 -> vector<16x128xf32>
    %293 = vector.extract_strided_slice %1 {offsets = [7, 0], sizes = [1, 128], strides = [1, 1]} : vector<9x128xf32> to vector<1x128xf32>
    %294 = vector.broadcast %293 : vector<1x128xf32> to vector<16x128xf32>
    %295 = arith.mulf %292, %294 : vector<16x128xf32>
    %296 = vector.extract_strided_slice %163 {offsets = [7, 0], sizes = [1, 128], strides = [1, 1]} : vector<9x128xf32> to vector<1x128xf32>
    %297 = vector.extract_strided_slice %295 {offsets = [0, 0], sizes = [8, 128], strides = [1, 1]} : vector<16x128xf32> to vector<8x128xf32>
    %298 = vector.broadcast %296 : vector<1x128xf32> to vector<8x128xf32>
    %299 = arith.mulf %298, %297 : vector<8x128xf32>
    %300 = arith.addf %286, %299 : vector<8x128xf32>
    %301 = vector.extract_strided_slice %195 {offsets = [7, 0], sizes = [1, 128], strides = [1, 1]} : vector<9x128xf32> to vector<1x128xf32>
    %302 = vector.extract_strided_slice %295 {offsets = [8, 0], sizes = [8, 128], strides = [1, 1]} : vector<16x128xf32> to vector<8x128xf32>
    %303 = vector.broadcast %301 : vector<1x128xf32> to vector<8x128xf32>
    %304 = arith.mulf %303, %302 : vector<8x128xf32>
    %305 = arith.addf %291, %304 : vector<8x128xf32>
    %c119_i32_59 = arith.constant 119 : i32
    %306 = tpu.dynamic_rotate %91 by %c119_i32_59 dim 1 : vector<16x128xf32>, i32 -> vector<16x128xf32>
    %307 = vector.extract_strided_slice %1 {offsets = [8, 0], sizes = [1, 128], strides = [1, 1]} : vector<9x128xf32> to vector<1x128xf32>
    %308 = vector.broadcast %307 : vector<1x128xf32> to vector<16x128xf32>
    %309 = arith.mulf %306, %308 : vector<16x128xf32>
    %310 = vector.extract_strided_slice %163 {offsets = [8, 0], sizes = [1, 128], strides = [1, 1]} : vector<9x128xf32> to vector<1x128xf32>
    %311 = vector.extract_strided_slice %309 {offsets = [0, 0], sizes = [8, 128], strides = [1, 1]} : vector<16x128xf32> to vector<8x128xf32>
    %312 = vector.broadcast %310 : vector<1x128xf32> to vector<8x128xf32>
    %313 = arith.mulf %312, %311 : vector<8x128xf32>
    %314 = arith.addf %300, %313 : vector<8x128xf32>
    %315 = vector.extract_strided_slice %195 {offsets = [8, 0], sizes = [1, 128], strides = [1, 1]} : vector<9x128xf32> to vector<1x128xf32>
    %316 = vector.extract_strided_slice %309 {offsets = [8, 0], sizes = [8, 128], strides = [1, 1]} : vector<16x128xf32> to vector<8x128xf32>
    %317 = vector.broadcast %315 : vector<1x128xf32> to vector<8x128xf32>
    %318 = arith.mulf %317, %316 : vector<8x128xf32>
    %319 = arith.addf %305, %318 : vector<8x128xf32>
    %320 = tpu.concatenate %314, %319 in 0 : vector<8x128xf32>, vector<8x128xf32> -> vector<16x128xf32>
    %321 = vector.extract_strided_slice %0 {offsets = [0, 9], sizes = [16, 1], strides = [1, 1]} : vector<32x16xf32> to vector<16x1xf32>
    %322 = vector.extract_strided_slice %0 {offsets = [0, 10], sizes = [16, 1], strides = [1, 1]} : vector<32x16xf32> to vector<16x1xf32>
    %cst_60 = arith.constant dense<0.000000e+00> : vector<128xf32>
    %323 = vector.multi_reduction <add>, %320, %cst_60 [0] : vector<16x128xf32> to vector<128xf32>
    %324 = vector.shape_cast %323 : vector<128xf32> to vector<1x128xf32>
    %cst_61 = arith.constant 1.600000e+01 : f32
    %325 = vector.broadcast %cst_61 : f32 to vector<1x128xf32>
    %326 = arith.divf %324, %325 : vector<1x128xf32>
    %327 = vector.broadcast %326 : vector<1x128xf32> to vector<16x128xf32>
    %328 = arith.subf %320, %327 : vector<16x128xf32>
    %329 = arith.mulf %328, %328 : vector<16x128xf32>
    %cst_62 = arith.constant dense<0.000000e+00> : vector<128xf32>
    %330 = vector.multi_reduction <add>, %329, %cst_62 [0] : vector<16x128xf32> to vector<128xf32>
    %331 = vector.shape_cast %330 : vector<128xf32> to vector<1x128xf32>
    %cst_63 = arith.constant 1.600000e+01 : f32
    %332 = vector.broadcast %cst_63 : f32 to vector<1x128xf32>
    %333 = arith.divf %331, %332 : vector<1x128xf32>
    %334 = vector.broadcast %326 : vector<1x128xf32> to vector<16x128xf32>
    %335 = arith.subf %320, %334 : vector<16x128xf32>
    %cst_64 = arith.constant 9.99999974E-6 : f32
    %336 = vector.broadcast %cst_64 : f32 to vector<1x128xf32>
    %337 = arith.addf %333, %336 : vector<1x128xf32>
    %338 = math.rsqrt %337 : vector<1x128xf32>
    %339 = vector.broadcast %338 : vector<1x128xf32> to vector<16x128xf32>
    %340 = arith.mulf %335, %339 : vector<16x128xf32>
    %341 = vector.broadcast %321 : vector<16x1xf32> to vector<16x128xf32>
    %342 = arith.mulf %340, %341 : vector<16x128xf32>
    %343 = vector.broadcast %322 : vector<16x1xf32> to vector<16x128xf32>
    %344 = arith.addf %342, %343 : vector<16x128xf32>
    %345 = arith.negf %344 : vector<16x128xf32>
    %346 = math.exp %345 : vector<16x128xf32>
    %cst_65 = arith.constant 1.000000e+00 : f32
    %347 = vector.broadcast %cst_65 : f32 to vector<16x128xf32>
    %348 = arith.addf %347, %346 : vector<16x128xf32>
    %349 = arith.divf %347, %348 : vector<16x128xf32>
    %350 = arith.mulf %344, %349 : vector<16x128xf32>
    %c0_66 = arith.constant 0 : index
    %c0_67 = arith.constant 0 : index
    %351 = vector.load %arg5[%c0_66, %c0_67] : memref<32x16xf32, #tpu.memory_space<vmem>>, vector<32x16xf32>
    %352 = arith.addf %350, %66 : vector<16x128xf32>
    %cst_68 = arith.constant dense<0.000000e+00> : vector<32x128xf32>
    %353 = tpu.matmul %351, %352, %cst_68 {dimension_numbers = #tpu.dot_dimension_numbers<[1], [0], [0], [1], [0, 0, 1, 1], [], []>} : vector<32x16xf32>, vector<16x128xf32>, vector<32x128xf32> -> vector<32x128xf32>
    %cst_69 = arith.constant dense<0.000000e+00> : vector<32x2xf32>
    %354 = tpu.matmul %353, %2, %cst_69 {dimension_numbers = #tpu.dot_dimension_numbers<[1], [0], [0], [1], [0, 0, 1, 1], [], []>} : vector<32x128xf32>, vector<128x2xf32>, vector<32x2xf32> -> vector<32x2xf32>
    %cst_70 = arith.constant 1.562500e-02 : f32
    %355 = vector.broadcast %cst_70 : f32 to vector<32x2xf32>
    %356 = arith.mulf %354, %355 : vector<32x2xf32>
    %357 = vector.extract_strided_slice %0 {offsets = [0, 11], sizes = [32, 1], strides = [1, 1]} : vector<32x16xf32> to vector<32x1xf32>
    %358 = vector.broadcast %357 : vector<32x1xf32> to vector<32x2xf32>
    %359 = arith.addf %356, %358 : vector<32x2xf32>
    %360 = vector.extract_strided_slice %0 {offsets = [0, 12], sizes = [32, 1], strides = [1, 1]} : vector<32x16xf32> to vector<32x1xf32>
    %361 = vector.extract_strided_slice %0 {offsets = [0, 13], sizes = [32, 1], strides = [1, 1]} : vector<32x16xf32> to vector<32x1xf32>
    %cst_71 = arith.constant dense<0.000000e+00> : vector<2xf32>
    %362 = vector.multi_reduction <add>, %359, %cst_71 [0] : vector<32x2xf32> to vector<2xf32>
    %363 = vector.shape_cast %362 : vector<2xf32> to vector<1x2xf32>
    %cst_72 = arith.constant 3.200000e+01 : f32
    %364 = vector.broadcast %cst_72 : f32 to vector<1x2xf32>
    %365 = arith.divf %363, %364 : vector<1x2xf32>
    %366 = vector.broadcast %365 : vector<1x2xf32> to vector<32x2xf32>
    %367 = arith.subf %359, %366 : vector<32x2xf32>
    %368 = arith.mulf %367, %367 : vector<32x2xf32>
    %cst_73 = arith.constant dense<0.000000e+00> : vector<2xf32>
    %369 = vector.multi_reduction <add>, %368, %cst_73 [0] : vector<32x2xf32> to vector<2xf32>
    %370 = vector.shape_cast %369 : vector<2xf32> to vector<1x2xf32>
    %cst_74 = arith.constant 3.200000e+01 : f32
    %371 = vector.broadcast %cst_74 : f32 to vector<1x2xf32>
    %372 = arith.divf %370, %371 : vector<1x2xf32>
    %373 = vector.broadcast %365 : vector<1x2xf32> to vector<32x2xf32>
    %374 = arith.subf %359, %373 : vector<32x2xf32>
    %cst_75 = arith.constant 9.99999974E-6 : f32
    %375 = vector.broadcast %cst_75 : f32 to vector<1x2xf32>
    %376 = arith.addf %372, %375 : vector<1x2xf32>
    %377 = math.rsqrt %376 : vector<1x2xf32>
    %378 = vector.broadcast %377 : vector<1x2xf32> to vector<32x2xf32>
    %379 = arith.mulf %374, %378 : vector<32x2xf32>
    %380 = vector.broadcast %360 : vector<32x1xf32> to vector<32x2xf32>
    %381 = arith.mulf %379, %380 : vector<32x2xf32>
    %382 = vector.broadcast %361 : vector<32x1xf32> to vector<32x2xf32>
    %383 = arith.addf %381, %382 : vector<32x2xf32>
    %cst_76 = arith.constant 0.000000e+00 : f32
    %384 = vector.broadcast %cst_76 : f32 to vector<32x2xf32>
    %385 = arith.maximumf %383, %384 : vector<32x2xf32>
    %c0_77 = arith.constant 0 : index
    %c0_78 = arith.constant 0 : index
    %386 = vector.load %arg6[%c0_77, %c0_78] : memref<32x32xf32, #tpu.memory_space<vmem>>, vector<32x32xf32>
    %cst_79 = arith.constant dense<0.000000e+00> : vector<32x2xf32>
    %387 = tpu.matmul %386, %385, %cst_79 {dimension_numbers = #tpu.dot_dimension_numbers<[1], [0], [0], [1], [0, 0, 1, 1], [], []>} : vector<32x32xf32>, vector<32x2xf32>, vector<32x2xf32> -> vector<32x2xf32>
    %388 = vector.extract_strided_slice %0 {offsets = [0, 14], sizes = [32, 1], strides = [1, 1]} : vector<32x16xf32> to vector<32x1xf32>
    %389 = vector.broadcast %388 : vector<32x1xf32> to vector<32x2xf32>
    %390 = arith.addf %387, %389 : vector<32x2xf32>
    %391 = vector.extract_strided_slice %390 {offsets = [0, 0], sizes = [16, 2], strides = [1, 1]} : vector<32x2xf32> to vector<16x2xf32>
    %392 = vector.extract_strided_slice %390 {offsets = [16, 0], sizes = [16, 2], strides = [1, 1]} : vector<32x2xf32> to vector<16x2xf32>
    %393 = arith.maximumf %391, %392 : vector<16x2xf32>
    %394 = arith.subf %391, %393 : vector<16x2xf32>
    %395 = math.exp %394 : vector<16x2xf32>
    %396 = arith.subf %392, %393 : vector<16x2xf32>
    %397 = math.exp %396 : vector<16x2xf32>
    %398 = arith.addf %395, %397 : vector<16x2xf32>
    %cst_80 = arith.constant 1.000000e+00 : f32
    %399 = vector.broadcast %cst_80 : f32 to vector<16x2xf32>
    %400 = arith.divf %399, %398 : vector<16x2xf32>
    %401 = arith.mulf %395, %400 : vector<16x2xf32>
    %402 = arith.mulf %397, %400 : vector<16x2xf32>
    %403 = tpu.concatenate %401, %402 in 0 : vector<16x2xf32>, vector<16x2xf32> -> vector<32x2xf32>
    %cst_81 = arith.constant dense<0.000000e+00> : vector<32x128xf32>
    %404 = tpu.matmul %403, %3, %cst_81 {dimension_numbers = #tpu.dot_dimension_numbers<[1], [0], [0], [1], [0, 0, 1, 1], [], []>} : vector<32x2xf32>, vector<2x128xf32>, vector<32x128xf32> -> vector<32x128xf32>
    %405 = vector.extract_strided_slice %404 {offsets = [0, 0], sizes = [16, 128], strides = [1, 1]} : vector<32x128xf32> to vector<16x128xf32>
    %406 = arith.mulf %350, %405 : vector<16x128xf32>
    %407 = vector.extract_strided_slice %404 {offsets = [16, 0], sizes = [16, 128], strides = [1, 1]} : vector<32x128xf32> to vector<16x128xf32>
    %408 = arith.mulf %66, %407 : vector<16x128xf32>
    %409 = arith.addf %406, %408 : vector<16x128xf32>
    %c0_82 = arith.constant 0 : index
    %c0_83 = arith.constant 0 : index
    %410 = vector.load %arg11[%c0_82, %c0_83] : memref<16x128xf32, #tpu.memory_space<vmem>>, vector<16x128xf32>
    tpu.vector_store %arg11[%c0_82, %c0_83], %409 {strides = array<i32>} : memref<16x128xf32, #tpu.memory_space<vmem>>, vector<16x128xf32>,
    return
  }
  func.func @transform_0(%arg0: i32) -> (i32, i32) {
    %c0_i32 = arith.constant 0 : i32
    %c0_i32_0 = arith.constant 0 : i32
    return %c0_i32, %arg0 : i32, i32
  }
  func.func @transform_1(%arg0: i32) -> (i32, i32) {
    %c0_i32 = arith.constant 0 : i32
    %c0_i32_0 = arith.constant 0 : i32
    %c0_i32_1 = arith.constant 0 : i32
    return %c0_i32, %c0_i32_0 : i32, i32
  }
  func.func @transform_2(%arg0: i32) -> (i32, i32) {
    %c0_i32 = arith.constant 0 : i32
    %c0_i32_0 = arith.constant 0 : i32
    %c0_i32_1 = arith.constant 0 : i32
    return %c0_i32, %c0_i32_0 : i32, i32
  }
  func.func @transform_3(%arg0: i32) -> (i32, i32) {
    %c0_i32 = arith.constant 0 : i32
    %c0_i32_0 = arith.constant 0 : i32
    %c0_i32_1 = arith.constant 0 : i32
    return %c0_i32, %c0_i32_0 : i32, i32
  }
  func.func @transform_4(%arg0: i32) -> (i32, i32) {
    %c0_i32 = arith.constant 0 : i32
    %c0_i32_0 = arith.constant 0 : i32
    %c0_i32_1 = arith.constant 0 : i32
    return %c0_i32, %c0_i32_0 : i32, i32
  }
  func.func @transform_5(%arg0: i32) -> (i32, i32) {
    %c0_i32 = arith.constant 0 : i32
    %c0_i32_0 = arith.constant 0 : i32
    %c0_i32_1 = arith.constant 0 : i32
    return %c0_i32, %c0_i32_0 : i32, i32
  }
  func.func @transform_6(%arg0: i32) -> (i32, i32) {
    %c0_i32 = arith.constant 0 : i32
    %c0_i32_0 = arith.constant 0 : i32
    %c0_i32_1 = arith.constant 0 : i32
    return %c0_i32, %c0_i32_0 : i32, i32
  }
  func.func @transform_7(%arg0: i32) -> (i32, i32) {
    %c0_i32 = arith.constant 0 : i32
    %c0_i32_0 = arith.constant 0 : i32
    %c0_i32_1 = arith.constant 0 : i32
    return %c0_i32, %c0_i32_0 : i32, i32
  }
  func.func @transform_8(%arg0: i32) -> (i32, i32) {
    %c0_i32 = arith.constant 0 : i32
    %c0_i32_0 = arith.constant 0 : i32
    %c0_i32_1 = arith.constant 0 : i32
    return %c0_i32, %c0_i32_0 : i32, i32
  }
  func.func @transform_9(%arg0: i32) -> (i32, i32) {
    %c0_i32 = arith.constant 0 : i32
    %c0_i32_0 = arith.constant 0 : i32
    %c0_i32_1 = arith.constant 0 : i32
    return %c0_i32, %c0_i32_0 : i32, i32
  }
  func.func @transform_10(%arg0: i32) -> (i32, i32) {
    %c0_i32 = arith.constant 0 : i32
    %c0_i32_0 = arith.constant 0 : i32
    return %c0_i32, %arg0 : i32, i32
  }
}

</mosaic_0001>

<bundles_post_ra>
// kernel: _lambda_.1
= control target key start
LH: loop header
LB: loop body
LE: loop exit
PB: predicated region body
PF: predicated region fallthrough
CT: control target
= control target key end

     0   :  { %v2278_v1 = vmov 0.0|0.0   ;;  %s2279_s15 = smov 8   ;;  %s2280_s16 = smov 9   ;;  %vm150_vm0 = vcmask 130048   ;;  %v2287_v5 = vmov 0   ;;  %v2288_v8 = vmov 1   ;;  %s2939_s0 = inlined_call_operand.vmem [shape: f32[16,128], index: 0, kind: input, shape index: {}]   ;;  %s2940_s1 = inlined_call_operand.vmem [shape: f32[40,144], index: 1, kind: input, shape index: {}]   ;;  %s2941_s6 = inlined_call_operand.vmem [shape: f32[32,16], index: 6, kind: input, shape index: {}]   ;;  %s2942_s7 = inlined_call_operand.vmem [shape: f32[9,128], index: 7, kind: input, shape index: {}]   ;;  %s2943_s2 = inlined_call_operand.vmem [shape: f32[8,16], index: 2, kind: input, shape index: {}]   ;;  %s2944_s8 = inlined_call_operand.vmem [shape: f32[128,2], index: 8, kind: input, shape index: {}]   ;;  %s2945_s3 = inlined_call_operand.vmem [shape: f32[18,8], index: 3, kind: input, shape index: {}]   ;;  %s2946_s9 = inlined_call_operand.vmem [shape: f32[2,128], index: 9, kind: input, shape index: {}]   ;;  %s2947_s4 = inlined_call_operand.vmem [shape: f32[32,16], index: 4, kind: input, shape index: {}]   ;;  %s2948_s5 = inlined_call_operand.vmem [shape: f32[32,32], index: 5, kind: input, shape index: {}]   ;;  %s2949_s10 = inlined_call_operand.vmem [shape: f32[16,128], index: 10, kind: output, shape index: {}]  }
   0x1   :  { %v2362_v0 = vld [vmem:[%s2939_s0] sm:$0xff]  ;;  %2062 = vmatprep.subr.bf16.mxu0 %v2278_v1  ;;  %2092 = vmatprep.subr.bf16.mxu1 %v2278_v1  ;;  %v2373_v2 = vld [vmem:[%s2939_s0 + $0x8] sm:$0xff]  ;;  %s2281_s19 = smov 7   ;;  %s2282_s20 = smov 1   ;;  %v64_v9 = vlaneseq  ;;  %vm2289_vm1 = vmmov 0   ;;  %vm471_vm2 = vcmask 64512  }
   0x2   :  { %70 = vrot.lane.b32.xlu1 %v2362_v0, %s2279_s15  ;;  %60 = vrot.lane.b32.xlu0 %v2362_v0, %s2280_s16  ;;  %v2075_v3 = vpack.c.bf16 %v2373_v2, %v2362_v0  ;;  %s2283_s0 = smov 127   ;;  %s2284_s21 = smov 121   ;;  %v141_v4 = vld [vmem:[%s2940_s1 + $0x8] sm:$0xff]  ;;  %v2412_v6 = vld [vmem:[%s2941_s6] sm:$0xff]  ;;  %vm756_vm3 = vcmask 1041408   ;;  %vm724_vm4 = vcmask 15360  }
   0x3   :  { %s2285_s22 = smov 120   ;;  %s2286_s23 = smov 119   ;;  %1766 = vmatprep.mubr.msk.f32.mxu0 %vm150_vm0, %v141_v4  ;;  %2213 = vset.pattern.permute.xlu1 %v2287_v5  ;;  %v2417_v7 = vld [vmem:[%s2941_s6 + $0x8] sm:$0xff]  ;;  %v2423_v10 = vshrl.u32 %v64_v9, 7  ;;  %v39_v12 = vld [vmem:[%s2942_s7] sm:$0xff]  ;;  %vm726_vm5 = vcmask 8192  }
   0x4   :  { %2212 = vset.pattern.permute.xlu0 %v2287_v5  ;;  %v2496_v60 = vld [vmem:[%s2942_s7 + $0x8] ss:$0 sm:$0xff]  ;;  %v140_v4 = vld [vmem:[%s2940_s1] sm:$0xff]  ;;  %v143_v5 = vld [vmem:[%s2940_s1 + $0x18] sm:$0xff]  ;;  %vm864_vm6 = vcmask 1046528   ;;  %vm751_vm7 = vcmask 1040384  }
   0x5   :  { %v2426_v11 = vsub.s32 0, %v2423_v10  ;;  %v2432_v13 = vsub.s32 1, %v2423_v10  ;;  %v2438_v17 = vsub.s32 2, %v2423_v10  ;;  %v2449_v24 = vsub.s32 3, %v2423_v10  ;;  %v145_v9 = vld [vmem:[%s2940_s1 + $0x28] sm:$0xff] }
   0x6   :  { %72 = vrot.lane.b32.xlu1 %v2373_v2, %s2279_s15  ;;  %62 = vrot.lane.b32.xlu0 %v2373_v2, %s2280_s16  ;;  %v2462_v39 = vsub.s32 5, %v2423_v10  ;;  %v2469_v44 = vsub.s32 6, %v2423_v10  ;;  %v2478_v50 = vsub.s32 7, %v2423_v10  ;;  %vm1534_vm8 = vcmask 261120  }
   0x7   :  { %v2435_v16 = vrot.slane %v39_v12, %v2426_v11  ;;  %v2441_v18 = vrot.slane %v39_v12, %v2432_v13  ;;  %v2446_v23 = vrot.slane %v39_v12, %v2438_v17  ;;  %v2456_v32 = vrot.slane %v39_v12, %v2449_v24 }
   0x8   :  { %v2466_v43 = vrot.slane %v39_v12, %v2462_v39  ;;  %v2475_v49 = vrot.slane %v39_v12, %v2469_v44  ;;  %v2487_v56 = vrot.slane %v39_v12, %v2478_v50  ;;  %v144_v12 = vld [vmem:[%s2940_s1 + $0x20] sm:$0xff] }
   0xa   :  { %82 = vrot.lane.b32.xlu1 %v2373_v2, %s2281_s19  ;;  %80 = vrot.lane.b32.xlu0 %v2362_v0, %s2281_s19 }
   0xe   :  { %92 = vrot.lane.b32.xlu1 %v2373_v2, %s2282_s20  ;;  %90 = vrot.lane.b32.xlu0 %v2362_v0, %s2282_s20 }
  0x12   :  { %102 = vrot.lane.b32.xlu1 %v2373_v2, %s2283_s0  ;;  %100 = vrot.lane.b32.xlu0 %v2362_v0, %s2283_s0 }
  0x16   :  { %112 = vrot.lane.b32.xlu1 %v2373_v2, %s2284_s21  ;;  %110 = vrot.lane.b32.xlu0 %v2362_v0, %s2284_s21 }
  0x1a   :  { %122 = vrot.lane.b32.xlu1 %v2373_v2, %s2285_s22  ;;  %120 = vrot.lane.b32.xlu0 %v2362_v0, %s2285_s22 }
  0x1e   :  { %132 = vrot.lane.b32.xlu1 %v2373_v2, %s2286_s23  ;;  %130 = vrot.lane.b32.xlu0 %v2362_v0, %s2286_s23 }
  0x22   :  { %288 = vperm.xlu1 %2213, %v2417_v7   ;;  %283 = vperm.xlu0 %2212, %v2412_v6  }
  0x26   :  { %2214 = vset.pattern.permute.xlu1 %v2288_v8  ;;  %2215 = vset.pattern.permute.xlu0 %v2288_v8  ;;  %v142_v8 = vld [vmem:[%s2940_s1 + $0x10] sm:$0xff] }
  0x27   :  { %294 = vperm.xlu1 %2214, %v2412_v6   ;;  %298 = vperm.xlu0 %2215, %v2417_v7  }
  0x74   :  { %v71_v14 = vpop.permute.xlu1 %70  ;;  %v61_v15 = vpop.permute.xlu0 %60 }
  0x75   :  { %v68_v21 = vmul.f32 %v2435_v16, %v61_v15  ;;  %v78_v25 = vmul.f32 %v2441_v18, %v71_v14  ;;  %v147_v14 = vld [vmem:[%s2940_s1 + $0x38] sm:$0xff]  ;;  %v146_v15 = vld [vmem:[%s2940_s1 + $0x30] sm:$0xff] }
  0x78   :  { %v73_v19 = vpop.permute.xlu1 %72  ;;  %v63_v20 = vpop.permute.xlu0 %62 }
  0x79   :  { %v69_v22 = vmul.f32 %v2435_v16, %v63_v20  ;;  %v79_v26 = vmul.f32 %v2441_v18, %v73_v19  ;;  %v149_v19 = vld [vmem:[%s2940_s1 + $0x48] sm:$0xff]  ;;  %v148_v20 = vld [vmem:[%s2940_s1 + $0x40] sm:$0xff] }
  0x7b   :  { %v2063_v27 = vpack.c.bf16 %v69_v22, %v68_v21  ;;  %v2066_v33 = vpack.c.bf16 %v79_v26, %v78_v25  ;;  %v2290_v21 = vmov 0.0   ;;  %v2291_v22 = vmov 2  }
  0x7c   :  { %v83_v28 = vpop.permute.xlu1 %82  ;;  %v81_v29 = vpop.permute.xlu0 %80  ;;  %1932 = vmatprep.mubr.msk.f32.mxu1 %vm2289_vm1, %v2290_v21  ;;  %2216 = vset.pattern.permute.xlu1 %v2291_v22  ;;  %v2292_v25 = vmov 4   ;;  %v2293_v26 = vmov 3  }
  0x7d   :  { %2064 = vmatpush1.bf16.msra.mxu0 %v2063_v27  ;;  %v89_v30 = vmul.f32 %v2446_v23, %v83_v28  ;;  %v88_v31 = vmul.f32 %v2446_v23, %v81_v29  ;;  %2218 = vset.pattern.permute.xlu0 %v2292_v25  ;;  %v2294_v27 = vmov 7   ;;  %v2295_v28 = vmov 8   ;;  %v37_v29 = vld [vmem:[%s2941_s6 + $0x10] sm:$0xff] }
  0x7e   :  { %2065 = vmatprep.subr.bf16.mxu0 %v2278_v1  ;;  %445 = vperm.xlu1 %2216, %v2412_v6  }
  0x7f   :  { %v2069_v36 = vpack.c.bf16 %v89_v30, %v88_v31  ;;  %459 = vperm.xlu0 %2218, %v2412_v6   ;;  %v2296_v30 = vmov 6   ;;  %v2297_v31 = vmov 5  }
  0x80   :  { %v93_v34 = vpop.permute.xlu1 %92  ;;  %v91_v35 = vpop.permute.xlu0 %90 }
  0x81   :  { %2067 = vmatpush1.bf16.msra.mxu0 %v2066_v33  ;;  %v99_v37 = vmul.f32 %v2456_v32, %v93_v34  ;;  %v98_v38 = vmul.f32 %v2456_v32, %v91_v35 }
  0x82   :  { %2068 = vmatprep.subr.bf16.mxu0 %v2278_v1  ;;  %2217 = vset.pattern.permute.xlu1 %v2293_v26 }
  0x83   :  { %v2072_v42 = vpack.c.bf16 %v99_v37, %v98_v38  ;;  %2220 = vset.pattern.permute.xlu0 %v2294_v27  ;;  %450 = vperm.xlu1 %2217, %v2412_v6  }
  0x84   :  { %v103_v40 = vpop.permute.xlu1 %102  ;;  %v101_v41 = vpop.permute.xlu0 %100  ;;  %330 = vperm.xlu0 %2220, %v2412_v6  }
  0x85   :  { %2070 = vmatpush1.bf16.msra.mxu0 %v2069_v36  ;;  %v109_v47 = vmul.f32 %v2466_v43, %v103_v40  ;;  %v108_v48 = vmul.f32 %v2466_v43, %v101_v41 }
  0x86   :  { %2071 = vmatprep.subr.bf16.mxu0 %v2278_v1 }
  0x87   :  { %v2078_v53 = vpack.c.bf16 %v109_v47, %v108_v48  ;;  %2219 = vset.pattern.permute.xlu1 %v2292_v25 }
  0x88   :  { %v113_v45 = vpop.permute.xlu1 %112  ;;  %v111_v46 = vpop.permute.xlu0 %110  ;;  %2223 = vset.pattern.permute.xlu0 %v2295_v28  ;;  %463 = vperm.xlu1 %2219, %v2417_v7  }
  0x89   :  { %2073 = vmatpush1.bf16.msra.mxu0 %v2072_v42  ;;  %v119_v54 = vmul.f32 %v2475_v49, %v113_v45  ;;  %v118_v55 = vmul.f32 %v2475_v49, %v111_v46  ;;  %344 = vperm.xlu0 %2223, %v2417_v7  }
  0x8a   :  { %2074 = vmatprep.subr.bf16.mxu0 %v2278_v1 }
  0x8b   :  { %v2081_v57 = vpack.c.bf16 %v119_v54, %v118_v55 }
  0x8c   :  { %v123_v51 = vpop.permute.xlu1 %122  ;;  %v121_v52 = vpop.permute.xlu0 %120  ;;  %468 = vperm.xlu1 %2219, %v37_v29  }
  0x8d   :  { %2076 = vmatpush1.bf16.msra.mxu0 %v2075_v3  ;;  %v129_v58 = vmul.f32 %v2487_v56, %v123_v51  ;;  %v128_v59 = vmul.f32 %v2487_v56, %v121_v52  ;;  %2225 = vset.pattern.permute.xlu0 %v2296_v30 }
  0x8e   :  { %2077 = vmatprep.subr.bf16.mxu0 %v2278_v1  ;;  %853 = vperm.xlu0 %2225, %v2412_v6  }
  0x8f   :  { %v2084_v63 = vpack.c.bf16 %v129_v58, %v128_v59 }
  0x90   :  { %v133_v61 = vpop.permute.xlu1 %132  ;;  %v131_v62 = vpop.permute.xlu0 %130  ;;  %2221 = vset.pattern.permute.xlu1 %v2294_v27 }
  0x91   :  { %2079 = vmatpush1.bf16.msra.mxu0 %v2078_v53  ;;  %v139_v0 = vmul.f32 %v2496_v60, %v133_v61  ;;  %v138_v2 = vmul.f32 %v2496_v60, %v131_v62  ;;  %334 = vperm.xlu1 %2221, %v2417_v7  }
  0x92   :  { %2080 = vmatprep.subr.bf16.mxu0 %v2278_v1  ;;  %995 = vperm.xlu0 %2225, %v37_v29  }
  0x93   :  { %v2087_v3 = vpack.c.bf16 %v139_v0, %v138_v2 }
  0x95   :  { %2082 = vmatpush1.bf16.msra.mxu0 %v2081_v57  ;;  %2222 = vset.pattern.permute.xlu1 %v2295_v28 }
  0x96   :  { %2083 = vmatprep.subr.bf16.mxu0 %v2278_v1  ;;  %340 = vperm.xlu1 %2222, %v2412_v6  }
  0x99   :  { %2085 = vmatpush1.bf16.msra.mxu0 %v2084_v63 }
  0x9a   :  { %2086 = vmatprep.subr.bf16.mxu0 %v2278_v1  ;;  %2224 = vset.pattern.permute.xlu1 %v2297_v31 }
  0x9b   :  { %843 = vperm.xlu1 %2224, %v2412_v6  }
  0x9d   :  { %2088 = vmatpush1.bf16.msra.mxu0 %v2087_v3 }
  0x9e   :  { %2089 = vmatprep.subr.bf16.mxu0 %v2278_v1 }
  0x9f   :  { %847 = vperm.xlu1 %2224, %v2417_v7  }
  0xa0   :  { %231 = vmatmul.mubr.f32.vlgmr.msra.gmra.mrb[0].mxu0 %v140_v4 }
  0xa1   :  { %1767 = vmatprep.mubr.msk.f32.mxu0 %vm150_vm0, %v143_v5 }
  0xa3   :  { %2226 = vset.pattern.permute.xlu1 %v2296_v30 }
  0xa4   :  { %236 = vmatmul.mubr.f32.gmra.mrb[2].mxu0 %v142_v8  ;;  %857 = vperm.xlu1 %2226, %v2417_v7  }
  0xa5   :  { %1768 = vmatprep.mubr.msk.f32.mxu0 %vm150_vm0, %v145_v9 }
  0xa8   :  { %241 = vmatmul.mubr.f32.gmra.mrb[4].mxu0 %v144_v12  ;;  %2227 = vset.pattern.permute.xlu1 %v2297_v31 }
  0xa9   :  { %1769 = vmatprep.mubr.msk.f32.mxu0 %vm150_vm0, %v147_v14  ;;  %989 = vperm.xlu1 %2227, %v37_v29  }
  0xac   :  { %246 = vmatmul.mubr.f32.gmra.mrb[6].mxu0 %v146_v15 }
  0xad   :  { %1770 = vmatprep.mubr.msk.f32.mxu0 %vm150_vm0, %v149_v19 }
  0xb0   :  { %251 = vmatmul.mubr.f32.gmra.mrb[8].mxu0 %v148_v20 }
  0xb1   :  { %1886 = vmatprep.mubr.msk.f32.mxu0 %vm2289_vm1, %v2290_v21 }
 0x173   :  { %v232_v33 = vpop.f32.mrb[0].mxu0 }
 0x174   :  { %v234_v34 = vpop.f32.mrb[1].mxu0 }
 0x177   :  { %v237_v35 = vpop.f32.mrb[2].mxu0 }
 0x178   :  { %v256_v36 = vadd.f32 %v237_v35, %v232_v33  ;;  %v239_v37 = vpop.f32.mrb[3].mxu0 }
 0x17a   :  { %v257_v38 = vrot.slane %v256_v36, 4 }
 0x17b   :  { %v242_v40 = vpop.f32.mrb[4].mxu0 }
 0x17c   :  { %v258_v41 = vadd.f32 %v257_v38, %v256_v36  ;;  %v244_v42 = vpop.f32.mrb[5].mxu0  ;;  %v289_v38 = vpop.permute.xlu1 %288 }
 0x17e   :  { %v259_v45 = vrot.slane %v258_v41, 2 }
 0x17f   :  { %v247_v46 = vpop.f32.mrb[6].mxu0 }
 0x180   :  { %v260_v47 = vadd.f32 %v259_v45, %v258_v41  ;;  %v305_v48 = vadd.f32 %v247_v46, %v242_v40  ;;  %v249_v51 = vpop.f32.mrb[7].mxu0 }
 0x182   :  { %v261_v52 = vrot.slane %v260_v47, 1  ;;  %v306_v53 = vrot.slane %v305_v48, 4 }
 0x184   :  { %v262_v54 = vadd.f32 %v261_v52, %v260_v47  ;;  %v307_v55 = vadd.f32 %v306_v53, %v305_v48  ;;  %v295_v47 = vpop.permute.xlu1 %294 }
 0x186   :  { %v264_v57 = vmul.f32 0.0625, %v262_v54  ;;  %v308_v58 = vrot.slane %v307_v55, 2 }
 0x188   :  { %v265_v59 = vsub.f32 %v232_v33, %v264_v57  ;;  %v266_v61 = vsub.f32 %v237_v35, %v264_v57  ;;  %v309_v62 = vadd.f32 %v308_v58, %v307_v55 }
 0x18a   :  { %v267_v63 = vmul.f32 %v265_v59, %v265_v59  ;;  %v268_v0 = vmul.f32 %v266_v61, %v266_v61  ;;  %v310_v2 = vrot.slane %v309_v62, 1 }
 0x18c   :  { %v269_v3 = vadd.f32 %v268_v0, %v267_v63  ;;  %v311_v4 = vadd.f32 %v310_v2, %v309_v62 }
 0x18e   :  { %v270_v5 = vrot.slane %v269_v3, 4  ;;  %v312_v8 = vmul.f32 0.0625, %v311_v4 }
 0x190   :  { %v271_v9 = vadd.f32 %v270_v5, %v269_v3  ;;  %v313_v12 = vsub.f32 %v242_v40, %v312_v8  ;;  %v314_v14 = vsub.f32 %v247_v46, %v312_v8  ;;  %v284_v40 = vpop.permute.xlu0 %283 }
 0x192   :  { %v272_v15 = vrot.slane %v271_v9, 2  ;;  %v315_v19 = vmul.f32 %v313_v12, %v313_v12  ;;  %v316_v20 = vmul.f32 %v314_v14, %v314_v14 }
 0x194   :  { %v273_v22 = vadd.f32 %v272_v15, %v271_v9  ;;  %v317_v25 = vadd.f32 %v316_v20, %v315_v19  ;;  %v299_v48 = vpop.permute.xlu0 %298 }
 0x196   :  { %v274_v26 = vrot.slane %v273_v22, 1  ;;  %v318_v27 = vrot.slane %v317_v25, 4 }
 0x198   :  { %v275_v28 = vadd.f32 %v274_v26, %v273_v22  ;;  %v319_v29 = vadd.f32 %v318_v27, %v317_v25  ;;  %v2570_v3 = vpop.permute.xlu0 %459  ;;  %v41_v25 = vld [vmem:[%s2944_s8] sm:$0xff]  ;;  %v42_v26 = vld [vmem:[%s2944_s8 + $0x8] sm:$0xff]  ;;  %v43_v27 = vld [vmem:[%s2944_s8 + $0x10] sm:$0xff] }
 0x19a   :  { %v276_v30 = vmul.f32 0.0625, %v275_v28  ;;  %v320_v31 = vrot.slane %v319_v29, 2  ;;  %v2621_v28 = vpack.c.bf16 %v42_v26, %v41_v25 }
 0x19c   :  { %v277_v33 = vadd.f32 1e-05, %v276_v30  ;;  %v321_v34 = vadd.f32 %v320_v31, %v319_v29  ;;  %v331_v8 = vpop.permute.xlu0 %330  ;;  %v44_v29 = vld [vmem:[%s2944_s8 + $0x18] sm:$0xff]  ;;  %2094 = vmatpush3.bf16.msra.mxu1 %v2621_v28  ;;  %v45_v31 = vld [vmem:[%s2944_s8 + $0x20] sm:$0xff] }
 0x19d   :  { %v2627_v30 = vpack.c.bf16 %v44_v29, %v43_v27  ;;  %2095 = vmatprep.subr.bf16.mxu1 %v2278_v1 }
 0x19e   :  { %2241 = vrsqrt.f32 %v277_v33  ;;  %v322_v35 = vrot.slane %v321_v34, 1  ;;  %v46_v33 = vld [vmem:[%s2944_s8 + $0x28] sm:$0xff] }
 0x1a0   :  { %v323_v36 = vadd.f32 %v322_v35, %v321_v34  ;;  %2097 = vmatpush3.bf16.msra.mxu1 %v2627_v30  ;;  %v2637_v34 = vpack.c.bf16 %v46_v33, %v45_v31  ;;  %v47_v35 = vld [vmem:[%s2944_s8 + $0x30] sm:$0xff] }
 0x1a1   :  { %2098 = vmatprep.subr.bf16.mxu1 %v2278_v1 }
 0x1a2   :  { %v324_v37 = vmul.f32 0.0625, %v323_v36  ;;  %v48_v36 = vld [vmem:[%s2944_s8 + $0x38] sm:$0xff] }
 0x1a4   :  { %v325_v41 = vadd.f32 1e-05, %v324_v37  ;;  %2100 = vmatpush3.bf16.msra.mxu1 %v2637_v34  ;;  %v2647_v37 = vpack.c.bf16 %v48_v36, %v47_v35 }
 0x1a5   :  { %2101 = vmatprep.subr.bf16.mxu1 %v2278_v1 }
 0x1a6   :  { %2243 = vrsqrt.f32 %v325_v41 }
 0x1a8   :  { %v2242_v42 = vpop.eup %2241  ;;  %2103 = vmatpush3.bf16.msra.mxu1 %v2647_v37 }
 0x1a9   :  { %v280_v45 = vmul.f32 %v2242_v42, %v266_v61  ;;  %v279_v46 = vmul.f32 %v2242_v42, %v265_v59  ;;  %v349_v59 = vld [vmem:[%s2943_s2] sm:$0xff]  ;;  %v2564_v61 = vpop.permute.xlu1 %445  ;;  %2104 = vmatprep.subr.bf16.mxu1 %v2278_v1  ;;  %v51_v42 = vld [vmem:[%s2944_s8 + $0x50] sm:$0xff] }
 0x1ab   :  { %v292_v51 = vmul.f32 %v289_v38, %v280_v45  ;;  %v291_v52 = vmul.f32 %v284_v40, %v279_v46  ;;  %v49_v38 = vld [vmem:[%s2944_s8 + $0x40] sm:$0xff]  ;;  %v50_v40 = vld [vmem:[%s2944_s8 + $0x48] sm:$0xff]  ;;  %v52_v45 = vld [vmem:[%s2944_s8 + $0x58] sm:$0xff] }
 0x1ac   :  { %v2657_v41 = vpack.c.bf16 %v50_v40, %v49_v38  ;;  %v2667_v46 = vpack.c.bf16 %v52_v45, %v51_v42 }
 0x1ad   :  { %v301_v53 = vadd.f32 %v295_v47, %v291_v52  ;;  %v302_v54 = vadd.f32 %v299_v48, %v292_v51  ;;  %v2568_v2 = vpop.permute.xlu1 %450  ;;  %v53_v47 = vld [vmem:[%s2944_s8 + $0x60] sm:$0xff]  ;;  %v54_v48 = vld [vmem:[%s2944_s8 + $0x68] sm:$0xff]  ;;  %v55_v52 = vld [vmem:[%s2944_s8 + $0x70] sm:$0xff] }
 0x1ae   :  { %2106 = vmatpush3.bf16.msra.mxu1 %v2657_v41  ;;  %v2677_v51 = vpack.c.bf16 %v54_v48, %v53_v47  ;;  %v455_v48 = vld [vmem:[%s2945_s3] sm:$0xff] }
 0x1af   :  { %v2553_v55 = vmax.f32 %v301_v53, 0.0  ;;  %v2555_v57 = vmax.f32 %v302_v54, 0.0  ;;  %2107 = vmatprep.subr.bf16.mxu1 %v2278_v1  ;;  %v56_v53 = vld [vmem:[%s2944_s8 + $0x78] sm:$0xff] }
 0x1b0   :  { %v2244_v58 = vpop.eup %2243  ;;  %v2687_v54 = vpack.c.bf16 %v56_v53, %v55_v52  ;;  %v456_v52 = vld [vmem:[%s2945_s3 + $0x8] sm:$0xff] }
 0x1b1   :  { %v2090_v62 = vpack.c.bf16 %v2555_v57, %v2553_v55  ;;  %v328_v63 = vmul.f32 %v2244_v58, %v314_v14  ;;  %v327_v0 = vmul.f32 %v2244_v58, %v313_v12  ;;  %v2572_v4 = vpop.permute.xlu1 %463  ;;  %v345_v12 = vpop.permute.xlu0 %344 }
 0x1b2   :  { %2109 = vmatpush3.bf16.msra.mxu1 %v2667_v46 }
 0x1b3   :  { %2091 = vmatpush3.bf16.msra.mxu0 %v2090_v62  ;;  %v337_v15 = vmul.f32 %v331_v8, %v327_v0  ;;  %2110 = vmatprep.subr.bf16.mxu1 %v2278_v1 }
 0x1b4   :  { %1889 = vmatprep.subr.mxu0 %v2290_v21 }
 0x1b5   :  { %v2574_v5 = vpop.permute.xlu1 %468 }
 0x1b6   :  { %1887 = vmatmul.mubr.msk.f32.vlgmr.msra.gmra.mrb[8].mxu0 %vm150_vm0, %v349_v59  ;;  %2112 = vmatpush3.bf16.msra.mxu1 %v2677_v51 }
 0x1b7   :  { %1891 = vmatprep.mubr.msk.f32.mxu0 %vm2289_vm1, %v2290_v21  ;;  %2113 = vmatprep.subr.bf16.mxu1 %v2278_v1 }
 0x1b9   :  { %v335_v9 = vpop.permute.xlu1 %334 }
 0x1ba   :  { %v338_v14 = vmul.f32 %v335_v9, %v328_v63  ;;  %2115 = vmatpush3.bf16.msra.mxu1 %v2687_v54 }
 0x1bb   :  { %2116 = vmatprep.subr.bf16.mxu1 %v2278_v1 }
 0x1bc   :  { %v2576_v19 = vadd.f32 %v345_v12, %v338_v14 }
 0x1bd   :  { %v341_v20 = vpop.permute.xlu1 %340 }
 0x1be   :  { %1002 = vrot.lane.b32.xlu0 %v2576_v19, %s2280_s16  ;;  %v2580_v22 = vadd.f32 %v341_v20, %v337_v15 }
 0x1c0   :  { %1000 = vrot.lane.b32.xlu1 %v2580_v22, %s2280_s16 }
 0x1c2   :  { %1020 = vrot.lane.b32.xlu0 %v2576_v19, %s2279_s15 }
 0x1c4   :  { %1018 = vrot.lane.b32.xlu1 %v2580_v22, %s2279_s15 }
 0x1c6   :  { %1036 = vrot.lane.b32.xlu0 %v2580_v22, %s2281_s19 }
 0x1c8   :  { %1038 = vrot.lane.b32.xlu1 %v2576_v19, %s2281_s19 }
 0x1ca   :  { %1056 = vrot.lane.b32.xlu0 %v2576_v19, %s2282_s20 }
 0x1cc   :  { %1054 = vrot.lane.b32.xlu1 %v2580_v22, %s2282_s20 }
 0x1ce   :  { %1086 = vrot.lane.b32.xlu0 %v2576_v19, %s2283_s0 }
 0x1d0   :  { %1084 = vrot.lane.b32.xlu1 %v2580_v22, %s2283_s0 }
 0x1d2   :  { %1104 = vrot.lane.b32.xlu0 %v2576_v19, %s2284_s21 }
 0x1d4   :  { %1102 = vrot.lane.b32.xlu1 %v2580_v22, %s2284_s21 }
 0x1d6   :  { %1122 = vrot.lane.b32.xlu0 %v2576_v19, %s2285_s22 }
 0x1d8   :  { %1120 = vrot.lane.b32.xlu1 %v2580_v22, %s2285_s22 }
 0x1da   :  { %1140 = vrot.lane.b32.xlu0 %v2576_v19, %s2286_s23 }
 0x1dc   :  { %1138 = vrot.lane.b32.xlu1 %v2580_v22, %s2286_s23 }
 0x289   :  { %v419_v58 = vpop.f32.mrb[8].mxu0 }
 0x28a   :  { %v424_v62 = vrot.slane %v419_v58, 4  ;;  %v1888_v63 = vpop.f32.mrb[9].mxu0 }
 0x28c   :  { %v425_v0 = vadd.f32 %v424_v62, %v419_v58 }
 0x28e   :  { %v426_v59 = vrot.slane %v425_v0, 2 }
 0x290   :  { %v427_v8 = vadd.f32 %v426_v59, %v425_v0 }
 0x292   :  { %v428_v9 = vrot.slane %v427_v8, 1 }
 0x294   :  { %v429_v12 = vadd.f32 %v428_v9, %v427_v8 }
 0x296   :  { %v431_v14 = vmul.f32 0.125, %v429_v12 }
 0x298   :  { %v432_v15 = vsub.f32 %v419_v58, %v431_v14 }
 0x29a   :  { %v433_v20 = vmul.f32 %v432_v15, %v432_v15 }
 0x29c   :  { %v434_v25 = vrot.slane %v433_v20, 4 }
 0x29e   :  { %v435_v26 = vadd.f32 %v434_v25, %v433_v20 }
 0x2a0   :  { %v436_v27 = vrot.slane %v435_v26, 2 }
 0x2a2   :  { %v437_v29 = vadd.f32 %v436_v27, %v435_v26 }
 0x2a4   :  { %v438_v31 = vrot.slane %v437_v29, 1 }
 0x2a6   :  { %v439_v33 = vadd.f32 %v438_v31, %v437_v29 }
 0x2a8   :  { %v440_v35 = vmul.f32 0.125, %v439_v33 }
 0x2aa   :  { %v441_v36 = vadd.f32 1e-05, %v440_v35 }
 0x2ac   :  { %2245 = vrsqrt.f32 %v441_v36 }
 0x2b6   :  { %v2246_v38 = vpop.eup %2245 }
 0x2b7   :  { %v443_v40 = vmul.f32 %v2246_v38, %v432_v15 }
 0x2b9   :  { %v448_v42 = vmul.f32 %v2564_v61, %v443_v40  ;;  %v457_v61 = vld [vmem:[%s2945_s3 + $0x10] sm:$0x3] }
 0x2bb   :  { %v453_v45 = vadd.f32 %v2568_v2, %v448_v42 }
 0x2bd   :  { %v454_v47 = vmax.f32 %v453_v45, 0.0 }
 0x2bf   :  { %1890 = vmatpush3.msra.mxu0 %v454_v47 }
 0x2c0   :  { %1892 = vmatmul.mubr.msk.f32.vlgmr.msra.gmra.mrb[10].mxu0 %vm471_vm2, %v455_v48  ;;  %1982 = vmatprep.subr.mxu0 %v2290_v21 }
 0x2c1   :  { %1894 = vmatprep.mubr.msk.f32.mxu0 %vm2289_vm1, %v2290_v21 }
 0x2c4   :  { %1895 = vmatmul.mubr.msk.f32.gmra.mrb[12].mxu0 %vm471_vm2, %v456_v52 }
 0x2c5   :  { %1897 = vmatprep.mubr.msk.f32.mxu0 %vm2289_vm1, %v2290_v21 }
 0x2c8   :  { %1898 = vmatmul.mubr.msk.f32.gmra.mrb[14].mxu0 %vm471_vm2, %v457_v61 }
 0x2c9   :  { %1984 = vmatprep.mubr.msk.f32.mxu0 %vm2289_vm1, %v2290_v21 }
 0x393   :  { %v547_v2 = vpop.f32.mrb[10].mxu0 }
 0x394   :  { %v2711_v53 = vadd.f32 %v547_v2, %v2570_v3  ;;  %v1893_v58 = vpop.f32.mrb[11].mxu0 }
 0x396   :  { %1933 = vmatmul.mubr.f32.vlgmr.msra.gmra.mrb[0].mxu1 %v2711_v53 }
 0x397   :  { %2118 = vmatpush3.bf16.msra.mxu1 %v2621_v28  ;;  %v552_v62 = vpop.f32.mrb[12].mxu0  ;;  %1935 = vmatprep.mubr.msk.f32.mxu1 %vm2289_vm1, %v2290_v21 }
 0x398   :  { %2119 = vmatprep.subr.bf16.mxu1 %v2278_v1  ;;  %v2719_v63 = vadd.f32 %v552_v62, %v2572_v4  ;;  %v1896_v0 = vpop.f32.mrb[13].mxu0  ;;  %v641_v4 = vmul.f32 %v2711_v53, %v2711_v53 }
 0x39a   :  { %1936 = vmatmul.mubr.f32.gmra.mrb[2].mxu1 %v2719_v63 }
 0x39b   :  { %2121 = vmatpush3.bf16.msra.mxu1 %v2627_v30  ;;  %v557_v3 = vpop.f32.mrb[14].mxu0  ;;  %1938 = vmatprep.mubr.msk.f32.mxu1 %vm2289_vm1, %v2290_v21 }
 0x39c   :  { %2122 = vmatprep.subr.bf16.mxu1 %v2278_v1  ;;  %v2727_v59 = vadd.f32 %v557_v3, %v2574_v5  ;;  %v1899_v8 = vpop.f32.mrb[15].mxu0  ;;  %v642_v5 = vmul.f32 %v2719_v63, %v2719_v63 }
 0x39e   :  { %1939 = vmatmul.mubr.f32.gmra.mrb[4].mxu1 %v2727_v59 }
 0x39f   :  { %2124 = vmatpush3.bf16.msra.mxu1 %v2637_v34  ;;  %1973 = vmatprep.mubr.msk.f32.mxu1 %vm2289_vm1, %v2290_v21 }
 0x3a0   :  { %2125 = vmatprep.subr.bf16.mxu1 %v2278_v1 }
 0x3a3   :  { %2127 = vmatpush3.bf16.msra.mxu1 %v2647_v37 }
 0x3a4   :  { %2128 = vmatprep.subr.bf16.mxu1 %v2278_v1 }
 0x3a7   :  { %2130 = vmatpush3.bf16.msra.mxu1 %v2657_v41 }
 0x3a8   :  { %2131 = vmatprep.subr.bf16.mxu1 %v2278_v1 }
 0x3ab   :  { %2133 = vmatpush3.bf16.msra.mxu1 %v2667_v46 }
 0x3ac   :  { %2134 = vmatprep.subr.bf16.mxu1 %v2278_v1 }
 0x3af   :  { %2136 = vmatpush3.bf16.msra.mxu1 %v2677_v51 }
 0x3b0   :  { %2137 = vmatprep.subr.bf16.mxu1 %v2278_v1  ;;  %v643_v1 = vmul.f32 %v2727_v59, %v2727_v59 }
 0x3b3   :  { %2139 = vmatpush3.bf16.msra.mxu1 %v2687_v54 }
 0x3b4   :  { %2145 = vmatprep.subr.bf16.mxu1 %v2621_v28 }
 0x3b6   :  { %1974 = vmatmul.mubr.f32.vlgmr.msra.gmra.mrb[6].mxu1 %v641_v4 }
 0x3b7   :  { %1976 = vmatprep.mubr.msk.f32.mxu1 %vm2289_vm1, %v2290_v21  ;;  %2147 = vmatpush3.bf16.msra.mxu1 %v2621_v28  ;;  %v2772_v28 = vld [vmem:[%s2946_s9] sm:$0x3] }
 0x3b8   :  { %2149 = vmatprep.subr.bf16.mxu1 %v2627_v30  ;;  %1983 = vmatpush3.msk.msra.mxu0 %vm756_vm3, %v2772_v28 }
 0x3b9   :  { %1987 = vmatprep.subr.mxu0 %v2290_v21 }
 0x3ba   :  { %1977 = vmatmul.mubr.f32.gmra.mrb[8].mxu1 %v642_v5 }
 0x3bb   :  { %1979 = vmatprep.mubr.msk.f32.mxu1 %vm2289_vm1, %v2290_v21  ;;  %2151 = vmatpush3.bf16.msra.mxu1 %v2627_v30  ;;  %v2298_v30 = vmov 9  }
 0x3bc   :  { %2153 = vmatprep.subr.bf16.mxu1 %v2637_v34  ;;  %2228 = vset.pattern.permute.xlu1 %v2298_v30 }
 0x3bd   :  { %2229 = vset.pattern.permute.xlu0 %v2298_v30  ;;  %1181 = vperm.xlu1 %2228, %v2412_v6  }
 0x3be   :  { %1980 = vmatmul.mubr.f32.gmra.mrb[10].mxu1 %v643_v1  ;;  %1185 = vperm.xlu0 %2229, %v2417_v7  }
 0x3bf   :  { %2155 = vmatpush3.bf16.msra.mxu1 %v2637_v34  ;;  %v2299_v34 = vmov 10  }
 0x3c0   :  { %2157 = vmatprep.subr.bf16.mxu1 %v2647_v37 }
 0x3c1   :  { %2230 = vset.pattern.permute.xlu1 %v2299_v34 }
 0x3c2   :  { %1191 = vperm.xlu1 %2230, %v2412_v6  }
 0x3c3   :  { %2159 = vmatpush3.bf16.msra.mxu1 %v2647_v37 }
 0x3c4   :  { %2161 = vmatprep.subr.bf16.mxu1 %v2657_v41 }
 0x3c6   :  { %1195 = vperm.xlu1 %2230, %v2417_v7  }
 0x3c7   :  { %2163 = vmatpush3.bf16.msra.mxu1 %v2657_v41 }
 0x3c8   :  { %2165 = vmatprep.subr.bf16.mxu1 %v2667_v46 }
 0x3cb   :  { %2167 = vmatpush3.bf16.msra.mxu1 %v2667_v46 }
 0x3cc   :  { %2169 = vmatprep.subr.bf16.mxu1 %v2677_v51 }
 0x3cf   :  { %2171 = vmatpush3.bf16.msra.mxu1 %v2677_v51 }
 0x3d0   :  { %2173 = vmatprep.subr.bf16.mxu1 %v2687_v54 }
 0x3d3   :  { %2175 = vmatpush3.bf16.msra.mxu1 %v2687_v54 }
 0x469   :  { %v627_v37 = vpop.f32.mrb[0].mxu1 }
 0x46a   :  { %v1934_v41 = vpop.f32.mrb[1].mxu1  ;;  %v725_v51 = vsel %vm724_vm4, %v627_v37, 0.0 }
 0x46d   :  { %v632_v46 = vpop.f32.mrb[2].mxu1 }
 0x46e   :  { %v727_v54 = vsel %vm726_vm5, %v632_v46, 0.0  ;;  %v1937_v9 = vpop.f32.mrb[3].mxu1  ;;  %v865_v14 = vrot.slane %v632_v46, 1 }
 0x46f   :  { %v728_v12 = vadd.f32 %v727_v54, %v725_v51 }
 0x471   :  { %v637_v15 = vpop.f32.mrb[4].mxu1  ;;  %v729_v29 = vrot.slane %v728_v12, 4 }
 0x472   :  { %v866_v20 = vrot.slane %v637_v15, 1  ;;  %v1940_v25 = vpop.f32.mrb[5].mxu1 }
 0x473   :  { %v730_v31 = vadd.f32 %v729_v29, %v728_v12 }
 0x474   :  { %v867_v6 = vsel %vm864_vm6, %v865_v14, %v866_v20  ;;  %v871_v7 = vsel %vm726_vm5, %v866_v20, 0.0 }
 0x475   :  { %v870_v26 = vsel %vm724_vm4, %v867_v6, 0.0  ;;  %v731_v35 = vrot.slane %v730_v31, 2 }
 0x476   :  { %v872_v27 = vadd.f32 %v871_v7, %v870_v26 }
 0x477   :  { %v732_v42 = vadd.f32 %v731_v35, %v730_v31 }
 0x478   :  { %v873_v33 = vrot.slane %v872_v27, 4 }
 0x479   :  { %v733_v58 = vrot.slane %v732_v42, 1 }
 0x47a   :  { %v874_v40 = vadd.f32 %v873_v33, %v872_v27 }
 0x47b   :  { %v734_v37 = vadd.f32 %v733_v58, %v732_v42 }
 0x47c   :  { %v875_v2 = vrot.slane %v874_v40, 2 }
 0x47d   :  { %v735_v14 = vmul.f32 0.0017361111, %v734_v37 }
 0x47e   :  { %v876_v1 = vadd.f32 %v875_v2, %v874_v40 }
 0x47f   :  { %v746_v26 = vmul.f32 %v735_v14, %v735_v14 }
 0x480   :  { %v877_v9 = vrot.slane %v876_v1, 1 }
 0x482   :  { %v878_v6 = vadd.f32 %v877_v9, %v876_v1 }
 0x484   :  { %v879_v33 = vmul.f32 0.0017361111, %v878_v6 }
 0x486   :  { %v897_v42 = vmul.f32 %v879_v33, %v879_v33 }
 0x489   :  { %v710_v36 = vpop.f32.mrb[6].mxu1 }
 0x48a   :  { %v1975_v38 = vpop.f32.mrb[7].mxu1  ;;  %v736_v47 = vsel %vm724_vm4, %v710_v36, 0.0 }
 0x48d   :  { %v715_v45 = vpop.f32.mrb[8].mxu1 }
 0x48e   :  { %v737_v48 = vsel %vm726_vm5, %v715_v45, 0.0  ;;  %v1978_v52 = vpop.f32.mrb[9].mxu1  ;;  %v882_v3 = vrot.slane %v715_v45, 1 }
 0x48f   :  { %v738_v61 = vadd.f32 %v737_v48, %v736_v47 }
 0x491   :  { %v739_v62 = vrot.slane %v738_v61, 4  ;;  %v720_v0 = vpop.f32.mrb[10].mxu1 }
 0x492   :  { %v883_v8 = vrot.slane %v720_v0, 1  ;;  %v1981_v4 = vpop.f32.mrb[11].mxu1  ;;  %v844_v0 = vpop.permute.xlu1 %843 }
 0x493   :  { %v740_v5 = vadd.f32 %v739_v62, %v738_v61 }
 0x494   :  { %v884_v30 = vsel %vm864_vm6, %v882_v3, %v883_v8  ;;  %v888_v34 = vsel %vm726_vm5, %v883_v8, 0.0  ;;  %v854_v8 = vpop.permute.xlu0 %853 }
 0x495   :  { %v741_v41 = vrot.slane %v740_v5, 2  ;;  %v887_v46 = vsel %vm724_vm4, %v884_v30, 0.0 }
 0x496   :  { %v889_v51 = vadd.f32 %v888_v34, %v887_v46  ;;  %v2797_v3 = vpop.permute.xlu1 %847 }
 0x497   :  { %v742_v54 = vadd.f32 %v741_v41, %v740_v5 }
 0x498   :  { %v890_v12 = vrot.slane %v889_v51, 4  ;;  %v2801_v5 = vpop.permute.xlu0 %995 }
 0x499   :  { %v743_v15 = vrot.slane %v742_v54, 1 }
 0x49a   :  { %v891_v20 = vadd.f32 %v890_v12, %v889_v51  ;;  %v2799_v4 = vpop.permute.xlu1 %857 }
 0x49b   :  { %v744_v25 = vadd.f32 %v743_v15, %v742_v54  ;;  %v1214_v15 = vld [vmem:[%s2947_s4] sm:$0xff] }
 0x49c   :  { %v892_v7 = vrot.slane %v891_v20, 2  ;;  %v1003_v30 = vpop.permute.xlu0 %1002 }
 0x49d   :  { %v745_v27 = vmul.f32 0.0017361111, %v744_v25 }
 0x49e   :  { %v893_v29 = vadd.f32 %v892_v7, %v891_v20  ;;  %v990_v1 = vpop.permute.xlu1 %989 }
 0x49f   :  { %v747_v31 = vsub.f32 %v745_v27, %v746_v26 }
 0x4a0   :  { %v894_v35 = vrot.slane %v893_v29, 1  ;;  %v1021_v37 = vpop.permute.xlu0 %1020 }
 0x4a1   :  { %v748_v36 = vmax.f32 %v747_v31, 0.0 }
 0x4a2   :  { %v895_v38 = vadd.f32 %v894_v35, %v893_v29  ;;  %v1001_v34 = vpop.permute.xlu1 %1000 }
 0x4a3   :  { %v749_v40 = vadd.f32 1e-05, %v748_v36 }
 0x4a4   :  { %v896_v45 = vmul.f32 0.0017361111, %v895_v38  ;;  %v1037_v51 = vpop.permute.xlu0 %1036 }
 0x4a5   :  { %2247 = vrsqrt.f32 %v749_v40 }
 0x4a6   :  { %v898_v47 = vsub.f32 %v896_v45, %v897_v42  ;;  %v1019_v41 = vpop.permute.xlu1 %1018  ;;  %v1040_v42 = vmul.f32 %v1037_v51, %v2446_v23  ;;  %v1068_v45 = vsub.s32 4, %v2423_v10 }
 0x4a8   :  { %v899_v48 = vmax.f32 %v898_v47, 0.0  ;;  %v1057_v25 = vpop.permute.xlu0 %1056 }
 0x4aa   :  { %v900_v52 = vadd.f32 1e-05, %v899_v48  ;;  %v1039_v9 = vpop.permute.xlu1 %1038 }
 0x4ac   :  { %2249 = vrsqrt.f32 %v900_v52  ;;  %v1087_v47 = vpop.permute.xlu0 %1086 }
 0x4ae   :  { %v1055_v26 = vpop.permute.xlu1 %1054 }
 0x4af   :  { %v2248_v61 = vpop.eup %2247 }
 0x4b0   :  { %v752_v2 = vsel %vm751_vm7, %v735_v14, %v2248_v61 }
 0x4b1   :  { %1985 = vmatmul.mubr.msk.f32.vlgmr.msra.gmra.mrb[16].mxu0 %vm724_vm4, %v752_v2 }
 0x4b2   :  { %1988 = vmatpush3.msk.msra.mxu0 %vm756_vm3, %v2772_v28  ;;  %1989 = vmatprep.mubr.msk.f32.mxu0 %vm2289_vm1, %v2290_v21 }
 0x4b6   :  { %v2250_v58 = vpop.eup %2249 }
 0x4b7   :  { %v902_v62 = vsel %vm751_vm7, %v879_v33, %v2250_v58  ;;  %v1022_v33 = vmul.f32 %v1019_v41, %v2441_v18  ;;  %v1085_v58 = vpop.permute.xlu1 %1084 }
 0x4b8   :  { %1990 = vmatmul.mubr.msk.f32.vlgmr.msra.gmra.mrb[18].mxu0 %vm724_vm4, %v902_v62 }
 0x4b9   :  { %1996 = vmatprep.mubr.msk.f32.mxu0 %vm150_vm0, %v1214_v15 }
 0x584   :  { %v826_v46 = vpop.f32.mrb[16].mxu0 }
 0x585   :  { %v833_v21 = vrot.slane %v826_v46, %v2426_v11  ;;  %v1986_v54 = vpop.f32.mrb[17].mxu0  ;;  %v839_v14 = vrot.slane %v826_v46, %v2432_v13 }
 0x587   :  { %v834_v12 = vsub.f32 %v2711_v53, %v833_v21  ;;  %v1004_v53 = vmul.f32 %v1001_v34, %v2435_v16  ;;  %v835_v46 = vsub.f32 %v2719_v63, %v833_v21 }
 0x589   :  { %v840_v20 = vmul.f32 %v839_v14, %v834_v12 }
 0x58b   :  { %v850_v6 = vmul.f32 %v844_v0, %v840_v20  ;;  %v972_v7 = vpop.f32.mrb[18].mxu0  ;;  %v1058_v0 = vmul.f32 %v1055_v26, %v2456_v32  ;;  %v1105_v20 = vpop.permute.xlu0 %1104  ;;  %v1023_v26 = vmul.f32 %v1021_v37, %v2441_v18 }
 0x58c   :  { %v979_v27 = vrot.slane %v972_v7, %v2426_v11  ;;  %v1991_v29 = vpop.f32.mrb[19].mxu0  ;;  %v985_v2 = vrot.slane %v972_v7, %v2432_v13 }
 0x58d   :  { %v2811_v31 = vadd.f32 %v854_v8, %v850_v6  ;;  %v841_v29 = vmul.f32 %v839_v14, %v835_v46 }
 0x58e   :  { %v980_v40 = vsub.f32 %v2719_v63, %v979_v27  ;;  %v981_v62 = vsub.f32 %v2727_v59, %v979_v27  ;;  %v1005_v59 = vmul.f32 %v1003_v30, %v2435_v16  ;;  %v1103_v27 = vpop.permute.xlu1 %1102 }
 0x58f   :  { %v1009_v35 = vrot.slane %v2811_v31, %v2426_v11  ;;  %v1027_v36 = vrot.slane %v2811_v31, %v2432_v13  ;;  %v1045_v38 = vrot.slane %v2811_v31, %v2438_v17  ;;  %v1063_v61 = vrot.slane %v2811_v31, %v2449_v24 }
 0x590   :  { %v986_v41 = vmul.f32 %v985_v2, %v980_v40  ;;  %v1075_v54 = vrot.slane %v2811_v31, %v1068_v45  ;;  %v987_v15 = vmul.f32 %v985_v2, %v981_v62  ;;  %v1093_v63 = vrot.slane %v2811_v31, %v2462_v39 }
 0x591   :  { %v1010_v48 = vmul.f32 %v1009_v35, %v1004_v53  ;;  %v1028_v52 = vmul.f32 %v1027_v36, %v1022_v33  ;;  %v1046_v34 = vmul.f32 %v1045_v38, %v1040_v42  ;;  %v1064_v10 = vmul.f32 %v1063_v61, %v1058_v0 }
 0x592   :  { %v992_v12 = vmul.f32 %v986_v41, %v2797_v3  ;;  %v1076_v21 = vmul.f32 %v1075_v54, %v2580_v22  ;;  %v1041_v36 = vmul.f32 %v1039_v9, %v2446_v23  ;;  %v1088_v38 = vmul.f32 %v1085_v58, %v2466_v43 }
 0x593   :  { %v1029_v8 = vadd.f32 %v1028_v52, %v1010_v48  ;;  %v993_v16 = vmul.f32 %v990_v1, %v987_v15  ;;  %v1059_v40 = vmul.f32 %v1057_v25, %v2456_v32  ;;  %v851_v42 = vmul.f32 %v2797_v3, %v841_v29  ;;  %v1123_v48 = vpop.permute.xlu0 %1122  ;;  %v1121_v1 = vpop.permute.xlu1 %1120 }
 0x594   :  { %v998_v7 = vadd.f32 %v992_v12, %v2799_v4  ;;  %v1111_v22 = vrot.slane %v2811_v31, %v2469_v44  ;;  %v1106_v9 = vmul.f32 %v1103_v27, %v2475_v49  ;;  %v1089_v3 = vmul.f32 %v1087_v47, %v2466_v43 }
 0x595   :  { %v1047_v51 = vadd.f32 %v1046_v34, %v1029_v8  ;;  %v999_v61 = vadd.f32 %v2801_v5, %v993_v16  ;;  %v861_v25 = vadd.f32 %v2799_v4, %v851_v42  ;;  %v1129_v62 = vrot.slane %v2811_v31, %v2478_v50 }
 0x596   :  { %v1015_v53 = vrot.slane %v998_v7, %v2432_v13  ;;  %v1033_v33 = vrot.slane %v998_v7, %v2438_v17  ;;  %v1051_v35 = vrot.slane %v998_v7, %v2449_v24  ;;  %v1069_v14 = vrot.slane %v998_v7, %v1068_v45 }
 0x597   :  { %v1065_v6 = vadd.f32 %v1064_v10, %v1047_v51  ;;  %v1094_v17 = vmul.f32 %v1093_v63, %v1088_v38  ;;  %v1081_v23 = vrot.slane %v998_v7, %v2462_v39  ;;  %v1099_v32 = vrot.slane %v998_v7, %v2469_v44  ;;  %v1141_v46 = vpop.permute.xlu0 %1140  ;;  %v1139_v47 = vpop.permute.xlu1 %1138 }
 0x598   :  { %v1016_v18 = vmul.f32 %v1015_v53, %v1005_v59  ;;  %v1034_v37 = vmul.f32 %v1033_v33, %v1023_v26  ;;  %v1052_v24 = vmul.f32 %v1051_v35, %v1041_v36  ;;  %v1070_v58 = vmul.f32 %v1069_v14, %v1059_v40 }
 0x599   :  { %v1077_v30 = vadd.f32 %v1076_v21, %v1065_v6  ;;  %v1112_v0 = vmul.f32 %v1111_v22, %v1106_v9  ;;  %v1082_v39 = vmul.f32 %v1081_v23, %v2576_v19  ;;  %v1117_v34 = vrot.slane %v998_v7, %v2478_v50 }
 0x59a   :  { %v1035_v52 = vadd.f32 %v1034_v37, %v1016_v18  ;;  %v1107_v5 = vmul.f32 %v1105_v20, %v2475_v49  ;;  %v1124_v41 = vmul.f32 %v1121_v1, %v2487_v56  ;;  %v1100_v10 = vmul.f32 %v1099_v32, %v1089_v3 }
 0x59b   :  { %v1095_v2 = vadd.f32 %v1094_v17, %v1077_v30  ;;  %v1135_v43 = vrot.slane %v999_v61, %v2426_v11  ;;  %v1125_v4 = vmul.f32 %v1123_v48, %v2487_v56  ;;  %v1147_v54 = vrot.slane %v861_v25, %v2426_v11  ;;  %v1186_v1 = vpop.permute.xlu0 %1185 }
 0x59c   :  { %v1053_v45 = vadd.f32 %v1052_v24, %v1035_v52  ;;  %v1130_v31 = vmul.f32 %v1129_v62, %v1124_v41  ;;  %v1118_v19 = vmul.f32 %v1117_v34, %v1107_v5  ;;  %v1153_v50 = vrot.slane %v999_v61, %v2432_v13  ;;  %v1182_v24 = vpop.permute.xlu1 %1181 }
 0x59d   :  { %v1113_v51 = vadd.f32 %v1112_v0, %v1095_v2  ;;  %v1143_v49 = vmul.f32 %v2496_v60, %v1141_v46  ;;  %v1142_v15 = vmul.f32 %v2496_v60, %v1139_v47  ;;  %v1136_v7 = vmul.f32 %v1135_v43, %v1125_v4  ;;  %v1215_v47 = vld [vmem:[%s2947_s4 + $0x8] sm:$0xff] }
 0x59e   :  { %v1071_v8 = vadd.f32 %v1070_v58, %v1053_v45 }
 0x59f   :  { %v1131_v20 = vadd.f32 %v1130_v31, %v1113_v51  ;;  %v1148_v59 = vmul.f32 %v1147_v54, %v1142_v15  ;;  %v1154_v27 = vmul.f32 %v1153_v50, %v1143_v49  ;;  %v1216_v31 = vld [vmem:[%s2947_s4 + $0x10] sm:$0xff]  ;;  %v1217_v54 = vld [vmem:[%s2947_s4 + $0x18] sm:$0xff]  ;;  %v2276_v50 = vld [vmem:[%s2941_s6] sm:$0xff] }
 0x5a0   :  { %v1083_v44 = vadd.f32 %v1082_v39, %v1071_v8  ;;  %v1192_v23 = vpop.permute.xlu1 %1191  ;;  %v38_v49 = vld [vmem:[%s2941_s6 + $0x18] sm:$0xff]  ;;  %v2277_v15 = vld [vmem:[%s2941_s6 + $0x10] sm:$0xff] }
 0x5a1   :  { %v1149_v29 = vadd.f32 %v1148_v59, %v1131_v20  ;;  %v2301_v20 = vmov 12  }
 0x5a2   :  { %v1101_v12 = vadd.f32 %v1100_v10, %v1083_v44 }
 0x5a4   :  { %v1119_v6 = vadd.f32 %v1118_v19, %v1101_v12  ;;  %v1196_v32 = vpop.permute.xlu1 %1195  ;;  %v2300_v12 = vmov 11   ;;  %v2275_v19 = vld [vmem:[%s2941_s6 + $0x8] sm:$0xff] }
 0x5a5   :  { %2232 = vset.pattern.permute.xlu1 %v2300_v12  ;;  %2231 = vset.pattern.permute.xlu0 %v2300_v12 }
 0x5a6   :  { %v1137_v26 = vadd.f32 %v1136_v7, %v1119_v6  ;;  %1411 = vperm.xlu1 %2232, %v2275_v19   ;;  %1407 = vperm.xlu0 %2231, %v2276_v50   ;;  %v2302_v6 = vmov 13  }
 0x5a8   :  { %v1155_v56 = vadd.f32 %v1154_v27, %v1137_v26 }
 0x5aa   :  { %v1156_v63 = vadd.f32 %v1155_v56, %v1149_v29  ;;  %1415 = vperm.xlu1 %2232, %v2277_v15   ;;  %1420 = vperm.xlu0 %2231, %v38_v49  }
 0x5ac   :  { %v1157_v21 = vrot.slane %v1156_v63, 4 }
 0x5ae   :  { %v1158_v53 = vadd.f32 %v1157_v21, %v1156_v63  ;;  %2233 = vset.pattern.permute.xlu1 %v2301_v20  ;;  %2234 = vset.pattern.permute.xlu0 %v2301_v20 }
 0x5af   :  { %1471 = vperm.xlu1 %2233, %v2276_v50   ;;  %1475 = vperm.xlu0 %2234, %v2275_v19  }
 0x5b0   :  { %v1159_v11 = vrot.slane %v1158_v53, 2 }
 0x5b2   :  { %v1160_v33 = vadd.f32 %v1159_v11, %v1158_v53 }
 0x5b3   :  { %2235 = vset.pattern.permute.xlu1 %v2302_v6  ;;  %1479 = vperm.xlu0 %2234, %v2277_v15  }
 0x5b4   :  { %v1161_v35 = vrot.slane %v1160_v33, 1  ;;  %1491 = vperm.xlu1 %2235, %v2276_v50  }
 0x5b6   :  { %v1162_v36 = vadd.f32 %v1161_v35, %v1160_v33 }
 0x5b7   :  { %2237 = vset.pattern.permute.xlu0 %v2302_v6 }
 0x5b8   :  { %v1163_v13 = vmul.f32 0.0625, %v1162_v36  ;;  %1495 = vperm.xlu1 %2235, %v2275_v19   ;;  %1499 = vperm.xlu0 %2237, %v2277_v15  }
 0x5ba   :  { %v1165_v38 = vsub.f32 %v1155_v56, %v1163_v13  ;;  %v1164_v16 = vsub.f32 %v1149_v29, %v1163_v13  ;;  %v1514_v29 = vld [vmem:[%s2948_s5] sm:$0xff]  ;;  %v2303_v56 = vmov 14  }
 0x5bc   :  { %v1166_v30 = vmul.f32 %v1164_v16, %v1164_v16  ;;  %v1167_v60 = vmul.f32 %v1165_v38, %v1165_v38  ;;  %2236 = vset.pattern.permute.xlu1 %v2301_v20  ;;  %2240 = vset.pattern.permute.xlu0 %v2303_v56 }
 0x5bd   :  { %1483 = vperm.xlu1 %2236, %v38_v49   ;;  %1527 = vperm.xlu0 %2240, %v2277_v15  }
 0x5be   :  { %v1168_v18 = vadd.f32 %v1167_v60, %v1166_v30 }
 0x5c0   :  { %v1169_v37 = vrot.slane %v1168_v18, 4 }
 0x5c1   :  { %2238 = vset.pattern.permute.xlu1 %v2302_v6 }
 0x5c2   :  { %v1170_v14 = vadd.f32 %v1169_v37, %v1168_v18  ;;  %1503 = vperm.xlu1 %2238, %v38_v49  }
 0x5c4   :  { %v1171_v40 = vrot.slane %v1170_v14, 2 }
 0x5c6   :  { %v1172_v42 = vadd.f32 %v1171_v40, %v1170_v14  ;;  %2239 = vset.pattern.permute.xlu1 %v2303_v56 }
 0x5c7   :  { %1519 = vperm.xlu1 %2239, %v2276_v50  }
 0x5c8   :  { %v1173_v22 = vrot.slane %v1172_v42, 1 }
 0x5ca   :  { %v1174_v48 = vadd.f32 %v1173_v22, %v1172_v42 }
 0x5cb   :  { %1523 = vperm.xlu1 %2239, %v2275_v19  }
 0x5cc   :  { %v1175_v17 = vmul.f32 0.0625, %v1174_v48 }
 0x5ce   :  { %v1176_v52 = vadd.f32 1e-05, %v1175_v17 }
 0x5cf   :  { %1531 = vperm.xlu1 %2239, %v38_v49  }
 0x5d0   :  { %2251 = vrsqrt.f32 %v1176_v52 }
 0x5da   :  { %v2252_v9 = vpop.eup %2251 }
 0x5db   :  { %v1178_v61 = vmul.f32 %v2252_v9, %v1164_v16  ;;  %v1179_v2 = vmul.f32 %v2252_v9, %v1165_v38 }
 0x5dd   :  { %v1188_v45 = vmul.f32 %v1182_v24, %v1178_v61  ;;  %v1189_v58 = vmul.f32 %v1186_v1, %v1179_v2 }
 0x5df   :  { %v1198_v3 = vadd.f32 %v1192_v23, %v1188_v45  ;;  %v1199_v25 = vadd.f32 %v1196_v32, %v1189_v58 }
 0x5e1   :  { %v1779_v62 = vmul.f32 -1.442695, %v1198_v3  ;;  %v1780_v0 = vmul.f32 -1.442695, %v1199_v25 }
 0x5e3   :  { %2253 = vpow2.f32 %v1779_v62 }
 0x5e4   :  { %2255 = vpow2.f32 %v1780_v0 }
 0x5ed   :  { %v2254_v8 = vpop.eup %2253 }
 0x5ee   :  { %v2256_v39 = vpop.eup %2255  ;;  %v1206_v34 = vadd.f32 1.0, %v2254_v8 }
 0x5ef   :  { %v1207_v5 = vadd.f32 1.0, %v2256_v39 }
 0x5f0   :  { %2257 = vrcp.f32 %v1206_v34 }
 0x5f1   :  { %2259 = vrcp.f32 %v1207_v5 }
 0x5fa   :  { %v2258_v41 = vpop.eup %2257 }
 0x5fb   :  { %v2260_v46 = vpop.eup %2259  ;;  %v2865_v51 = vmul.f32 %v2258_v41, %v1198_v3 }
 0x5fc   :  { %v2867_v44 = vmul.f32 %v2260_v46, %v1199_v25 }
 0x5fd   :  { %v1218_v10 = vadd.f32 %v2865_v51, %v2553_v55 }
 0x5fe   :  { %v1219_v43 = vadd.f32 %v2867_v44, %v2555_v57 }
 0x600   :  { %v2140_v4 = vpack.c.bf16 %v1219_v43, %v1218_v10 }
 0x602   :  { %2141 = vmatprep.subr.bf16.mxu0 %v2140_v4 }
 0x603   :  { %2143 = vmatpush3.bf16.msra.mxu0 %v2140_v4 }
 0x606   :  { %1997 = vmatmul.mubr.msk.f32.vlgmr.msra.gmra.mrb[20].mxu0 %vm150_vm0, %v1215_v47 }
 0x607   :  { %1999 = vmatprep.mubr.msk.f32.mxu0 %vm150_vm0, %v1216_v31 }
 0x60a   :  { %2000 = vmatmul.mubr.msk.f32.gmra.mrb[22].mxu0 %vm150_vm0, %v1217_v54 }
 0x60b   :  { %2048 = vmatprep.mubr.msk.f32.mxu0 %vm1534_vm8, %v1514_v29 }
 0x625   :  { %v1408_v63 = vpop.permute.xlu0 %1407  ;;  %v1412_v11 = vpop.permute.xlu1 %1411 }
 0x629   :  { %v1421_v18 = vpop.permute.xlu0 %1420  ;;  %v1416_v42 = vpop.permute.xlu1 %1415 }
 0x62e   :  { %v1472_v50 = vpop.permute.xlu1 %1471 }
 0x6d9   :  { %v1998_v7 = vpop.f32.mrb[20].mxu0 }
 0x6da   :  { %v1298_v59 = vpop.f32.mrb[21].mxu0 }
 0x6db   :  { %2034 = vmatprep.mubr.f32.mxu1 %v1298_v59 }
 0x6dc   :  { %2035 = vmatmul.mubr.f32.vlgmr.msra.gmra.mrb[12].mxu1 %v1998_v7  ;;  %v1492_v7 = vpop.permute.xlu1 %1491 }
 0x6dd   :  { %v2001_v26 = vpop.f32.mrb[22].mxu0 }
 0x6de   :  { %v1308_v27 = vpop.f32.mrb[23].mxu0 }
 0x6df   :  { %2037 = vmatprep.mubr.f32.mxu1 %v1308_v27 }
 0x6e0   :  { %2038 = vmatmul.mubr.f32.gmra.mrb[14].mxu1 %v2001_v26  ;;  %v1476_v26 = vpop.permute.xlu0 %1475  ;;  %v1496_v27 = vpop.permute.xlu1 %1495 }
 0x6e4   :  { %v1480_v29 = vpop.permute.xlu0 %1479  ;;  %v1484_v56 = vpop.permute.xlu1 %1483 }
 0x7af   :  { %v2036_v21 = vpop.f32.mrb[12].mxu1 }
 0x7b0   :  { %v1403_v53 = vmul.f32 0.015625, %v2036_v21  ;;  %v1383_v33 = vpop.f32.mrb[13].mxu1 }
 0x7b1   :  { %v1402_v35 = vmul.f32 0.015625, %v1383_v33 }
 0x7b2   :  { %v1424_v36 = vadd.f32 %v1412_v11, %v1403_v53 }
 0x7b3   :  { %v2039_v13 = vpop.f32.mrb[14].mxu1  ;;  %v1423_v38 = vadd.f32 %v1408_v63, %v1402_v35  ;;  %v1500_v35 = vpop.permute.xlu0 %1499 }
 0x7b4   :  { %v1428_v16 = vsel %vm724_vm4, %v1424_v36, 0.0  ;;  %v1405_v30 = vmul.f32 0.015625, %v2039_v13  ;;  %v1393_v60 = vpop.f32.mrb[15].mxu1 }
 0x7b5   :  { %v1427_v37 = vsel %vm724_vm4, %v1423_v38, 0.0  ;;  %v1404_v14 = vmul.f32 0.015625, %v1393_v60 }
 0x7b6   :  { %v1429_v40 = vadd.f32 %v1428_v16, %v1427_v37  ;;  %v1426_v48 = vadd.f32 %v1421_v18, %v1405_v30 }
 0x7b7   :  { %v1425_v22 = vadd.f32 %v1416_v42, %v1404_v14 }
 0x7b8   :  { %v1432_v24 = vsel %vm724_vm4, %v1426_v48, 0.0 }
 0x7b9   :  { %v1430_v17 = vsel %vm724_vm4, %v1425_v22, 0.0 }
 0x7ba   :  { %v1431_v52 = vadd.f32 %v1430_v17, %v1429_v40 }
 0x7bc   :  { %v1433_v23 = vadd.f32 %v1432_v24, %v1431_v52  ;;  %v1515_v24 = vld [vmem:[%s2948_s5 + $0x8] sm:$0xff] }
 0x7be   :  { %v1434_v9 = vrot.slane %v1433_v23, 4 }
 0x7c0   :  { %v1435_v1 = vadd.f32 %v1434_v9, %v1433_v23  ;;  %v1516_v23 = vld [vmem:[%s2948_s5 + $0x10] sm:$0xff]  ;;  %v1517_v9 = vld [vmem:[%s2948_s5 + $0x18] sm:$0xff] }
 0x7c2   :  { %v1436_v61 = vrot.slane %v1435_v1, 2 }
 0x7c4   :  { %v1437_v2 = vadd.f32 %v1436_v61, %v1435_v1 }
 0x7c6   :  { %v1438_v45 = vrot.slane %v1437_v2, 1 }
 0x7c8   :  { %v1439_v58 = vadd.f32 %v1438_v45, %v1437_v2 }
 0x7ca   :  { %v1441_v32 = vmul.f32 0.03125, %v1439_v58  ;;  %v1528_v58 = vpop.permute.xlu0 %1527 }
 0x7cc   :  { %v1443_v3 = vsub.f32 %v1424_v36, %v1441_v32  ;;  %v1444_v25 = vsub.f32 %v1425_v22, %v1441_v32  ;;  %v1445_v62 = vsub.f32 %v1426_v48, %v1441_v32  ;;  %v1442_v0 = vsub.f32 %v1423_v38, %v1441_v32  ;;  %v1504_v36 = vpop.permute.xlu1 %1503 }
 0x7ce   :  { %v1446_v8 = vmul.f32 %v1442_v0, %v1442_v0  ;;  %v1447_v39 = vmul.f32 %v1443_v3, %v1443_v3  ;;  %v1448_v34 = vmul.f32 %v1444_v25, %v1444_v25  ;;  %v1449_v5 = vmul.f32 %v1445_v62, %v1445_v62 }
 0x7d0   :  { %v1450_v41 = vsel %vm724_vm4, %v1446_v8, 0.0  ;;  %v1451_v46 = vsel %vm724_vm4, %v1447_v39, 0.0  ;;  %v1453_v43 = vsel %vm724_vm4, %v1448_v34, 0.0  ;;  %v1455_v47 = vsel %vm724_vm4, %v1449_v5, 0.0  ;;  %v1520_v1 = vpop.permute.xlu1 %1519 }
 0x7d1   :  { %v1452_v10 = vadd.f32 %v1451_v46, %v1450_v41 }
 0x7d3   :  { %v1454_v4 = vadd.f32 %v1453_v43, %v1452_v10 }
 0x7d4   :  { %v1524_v61 = vpop.permute.xlu1 %1523 }
 0x7d5   :  { %v1456_v31 = vadd.f32 %v1455_v47, %v1454_v4 }
 0x7d7   :  { %v1457_v54 = vrot.slane %v1456_v31, 4 }
 0x7d8   :  { %v1532_v32 = vpop.permute.xlu1 %1531 }
 0x7d9   :  { %v1458_v12 = vadd.f32 %v1457_v54, %v1456_v31 }
 0x7db   :  { %v1459_v19 = vrot.slane %v1458_v12, 2 }
 0x7dd   :  { %v1460_v49 = vadd.f32 %v1459_v19, %v1458_v12 }
 0x7df   :  { %v1461_v15 = vrot.slane %v1460_v49, 1 }
 0x7e1   :  { %v1462_v20 = vadd.f32 %v1461_v15, %v1460_v49 }
 0x7e3   :  { %v1463_v6 = vmul.f32 0.03125, %v1462_v20 }
 0x7e5   :  { %v1464_v59 = vadd.f32 1e-05, %v1463_v6 }
 0x7e7   :  { %2261 = vrsqrt.f32 %v1464_v59 }
 0x7f1   :  { %v2262_v63 = vpop.eup %2261 }
 0x7f2   :  { %v1466_v21 = vmul.f32 %v2262_v63, %v1442_v0  ;;  %v1467_v53 = vmul.f32 %v2262_v63, %v1443_v3  ;;  %v1468_v11 = vmul.f32 %v2262_v63, %v1444_v25  ;;  %v1469_v33 = vmul.f32 %v2262_v63, %v1445_v62 }
 0x7f4   :  { %v1486_v13 = vmul.f32 %v1472_v50, %v1466_v21  ;;  %v1487_v38 = vmul.f32 %v1476_v26, %v1467_v53  ;;  %v1488_v16 = vmul.f32 %v1480_v29, %v1468_v11  ;;  %v1489_v30 = vmul.f32 %v1484_v56, %v1469_v33 }
 0x7f6   :  { %v1506_v60 = vadd.f32 %v1492_v7, %v1486_v13  ;;  %v1507_v18 = vadd.f32 %v1496_v27, %v1487_v38  ;;  %v1508_v37 = vadd.f32 %v1500_v35, %v1488_v16  ;;  %v1509_v14 = vadd.f32 %v1504_v36, %v1489_v30 }
 0x7f8   :  { %v1510_v40 = vmax.f32 %v1506_v60, 0.0  ;;  %v1511_v42 = vmax.f32 %v1507_v18, 0.0  ;;  %v1512_v22 = vmax.f32 %v1508_v37, 0.0  ;;  %v1513_v48 = vmax.f32 %v1509_v14, 0.0 }
 0x7fa   :  { %v2176_v17 = vpack.c.bf16 %v1511_v42, %v1510_v40  ;;  %v2180_v52 = vpack.c.bf16 %v1513_v48, %v1512_v22 }
 0x7fc   :  { %2177 = vmatprep.subr.bf16.mxu0 %v2176_v17 }
 0x7fd   :  { %2179 = vmatpush3.bf16.msra.mxu0 %v2176_v17 }
 0x7fe   :  { %2181 = vmatprep.subr.bf16.mxu0 %v2180_v52 }
 0x801   :  { %2183 = vmatpush3.bf16.msra.mxu0 %v2180_v52 }
 0x802   :  { %2054 = vmatprep.subr.msk.mxu0 %vm756_vm3, %v2772_v28 }
 0x804   :  { %2049 = vmatmul.mubr.msk.f32.vlgmr.msra.gmra.mrb[24].mxu0 %vm1534_vm8, %v1515_v24 }
 0x805   :  { %2051 = vmatprep.mubr.msk.f32.mxu0 %vm1534_vm8, %v1516_v23  ;;  %2055 = vmatpush3.msk.msra.mxu0 %vm756_vm3, %v2772_v28 }
 0x808   :  { %2052 = vmatmul.mubr.msk.f32.gmra.mrb[26].mxu0 %vm1534_vm8, %v1517_v9 }
 0x8d7   :  { %v2050_v2 = vpop.f32.mrb[24].mxu0 }
 0x8d8   :  { %v1613_v45 = vpop.f32.mrb[25].mxu0  ;;  %v1619_v25 = vadd.f32 %v2050_v2, %v1524_v61 }
 0x8d9   :  { %v1614_v8 = vadd.f32 %v1613_v45, %v1520_v1 }
 0x8db   :  { %v2053_v3 = vpop.f32.mrb[26].mxu0 }
 0x8dc   :  { %v1629_v62 = vadd.f32 %v2053_v3, %v1532_v32  ;;  %v1623_v0 = vpop.f32.mrb[27].mxu0 }
 0x8dd   :  { %v1624_v39 = vadd.f32 %v1623_v0, %v1528_v58 }
 0x8de   :  { %v1633_v34 = vmax.f32 %v1619_v25, %v1629_v62 }
 0x8df   :  { %v1632_v5 = vmax.f32 %v1614_v8, %v1624_v39 }
 0x8e0   :  { %v1635_v41 = vsub.f32 %v1619_v25, %v1633_v34  ;;  %v1641_v46 = vsub.f32 %v1629_v62, %v1633_v34 }
 0x8e1   :  { %v1634_v10 = vsub.f32 %v1614_v8, %v1632_v5  ;;  %v1640_v28 = vsub.f32 %v1624_v39, %v1632_v5 }
 0x8e2   :  { %v1638_v43 = vmul.f32 1.442695, %v1635_v41  ;;  %v1644_v4 = vmul.f32 1.442695, %v1641_v46 }
 0x8e3   :  { %v1636_v47 = vmul.f32 1.442695, %v1634_v10  ;;  %v1642_v31 = vmul.f32 1.442695, %v1640_v28 }
 0x8e4   :  { %2263 = vpow2.f32 %v1638_v43 }
 0x8e5   :  { %2265 = vpow2.f32 %v1644_v4 }
 0x8e6   :  { %2267 = vpow2.f32 %v1636_v47 }
 0x8e7   :  { %2269 = vpow2.f32 %v1642_v31 }
 0x8ee   :  { %v2264_v54 = vpop.eup %2263 }
 0x8ef   :  { %v2266_v12 = vpop.eup %2265 }
 0x8f0   :  { %v2268_v19 = vpop.eup %2267  ;;  %v1647_v50 = vadd.f32 %v2266_v12, %v2264_v54 }
 0x8f1   :  { %v2270_v49 = vpop.eup %2269 }
 0x8f2   :  { %2271 = vrcp.f32 %v1647_v50  ;;  %v1646_v15 = vadd.f32 %v2270_v49, %v2268_v19 }
 0x8f4   :  { %2273 = vrcp.f32 %v1646_v15 }
 0x8fc   :  { %v2272_v20 = vpop.eup %2271 }
 0x8fd   :  { %v1653_v6 = vmul.f32 %v2272_v20, %v2264_v54  ;;  %v1655_v7 = vmul.f32 %v2272_v20, %v2266_v12 }
 0x8fe   :  { %v2274_v59 = vpop.eup %2273 }
 0x8ff   :  { %v1652_v26 = vmul.f32 %v2274_v59, %v2268_v19  ;;  %v1654_v27 = vmul.f32 %v2274_v59, %v2270_v49 }
 0x901   :  { %2056 = vmatprep.mubr.msk.f32.mxu0 %vm724_vm4, %v1652_v26 }
 0x902   :  { %2057 = vmatmul.mubr.msk.f32.vlgmr.msra.gmra.mrb[28].mxu0 %vm724_vm4, %v1653_v6 }
 0x903   :  { %2059 = vmatprep.mubr.msk.f32.mxu0 %vm724_vm4, %v1654_v27 }
 0x906   :  { %2060 = vmatmul.mubr.msk.f32.gmra.mrb[30].mxu0 %vm724_vm4, %v1655_v7 }
 0x9d5   :  { %v2058_v29 = vpop.f32.mrb[28].mxu0 }
 0x9d6   :  { %v1734_v56 = vpop.f32.mrb[29].mxu0  ;;  %v1754_v21 = vmul.f32 %v2058_v29, %v2867_v44 }
 0x9d7   :  { %v1753_v33 = vmul.f32 %v1734_v56, %v2865_v51 }
 0x9d9   :  { %v2061_v63 = vpop.f32.mrb[30].mxu0 }
 0x9da   :  { %v1756_v53 = vmul.f32 %v2061_v63, %v2555_v57  ;;  %v1744_v11 = vpop.f32.mrb[31].mxu0 }
 0x9db   :  { %v1755_v35 = vmul.f32 %v1744_v11, %v2553_v55 }
 0x9dc   :  { %v1758_v36 = vadd.f32 %v1756_v53, %v1754_v21 }
 0x9dd   :  { %v1757_v13 = vadd.f32 %v1755_v35, %v1753_v33 }
 0x9de   :  { %1760 = vst [vmem:[%s2949_s10 + $0x8] sm:$0xff] %v1758_v36 }
 0x9df   :  { %1759 = vst [vmem:[%s2949_s10] sm:$0xff] %v1757_v13 }

</bundles_post_ra>
